<compile_context>
chip_gen: v7x
topology: tpu7x:2x2x1
jax: 0.10.0
libtpu: 0.0.40
codegen_flags: <defaults>
</compile_context>

<pallas_src>
import jax
import jax.numpy as jnp
import numpy as np
from jax.experimental import pallas as pl
from jax.experimental.pallas import tpu as pltpu

LANE = 128  # TPU lane width; every feature/contraction dim is zero-padded to this.


def _round_up(n, m):
    return ((n + m - 1) // m) * m


def _pad2(a, rows, cols):
    r, c = a.shape
    return jnp.pad(a, ((0, rows - r), (0, cols - c)))


def _num_tensorcores():
    """v7x has 2 TensorCores per chip; v5e/v6e have 1."""
    try:
        kind = jax.devices()[0].device_kind.lower()
    except Exception:
        return 1
    return 2 if ("v7" in kind or "7x" in kind) else 1


# ----------------------------- fused EdgeConv kernel -----------------------------
def edgeconv_fused_kernel(xt_ref, pxi_ref, pdx_ref, grow_ref, gdiff_ref, posb_ref,
                          aggmat_ref, w2e_ref, b2e_ref,
                          w1nx_ref, w1na_ref, b1n_ref, w2n_ref, b2n_ref,
                          out_ref):
    """One fused EdgeConvBase forward for one node tile (one tile per TensorCore).

    The x_i / (x_j - x_i) gathers are pre-folded into msg_net layer 1 as
    per-node products P_xi / P_dx; one-hot rows of grow/gdiff select rows
    exactly on the MXU. The position term arrives as a precomputed additive
    bias. The mean scatter is a (tile_n, E) @ (E, MP) matmul whose rows already
    carry 1/deg weights.
    """
    # msg_net = Linear -> tanh -> Linear (layer-1 weight fused with the gathers)
    h = jnp.tanh(
        jnp.dot(grow_ref[...], pxi_ref[...], preferred_element_type=jnp.float32)
        + jnp.dot(gdiff_ref[...], pdx_ref[...], preferred_element_type=jnp.float32)
        + posb_ref[...])                                                      # (E, HP)
    msg = jnp.dot(h, w2e_ref[...], preferred_element_type=jnp.float32) + b2e_ref[...]  # (E, MP)

    # mean scatter into this node tile (aggmat block already holds 1/deg weights)
    aggr = jnp.dot(aggmat_ref[...], msg, preferred_element_type=jnp.float32)  # (tile_n, MP)

    # aggr_net on concat([x, aggr]) with split weights; x arrives node-tiled.
    hn = jnp.tanh(
        jnp.dot(xt_ref[...], w1nx_ref[...], preferred_element_type=jnp.float32)
        + jnp.dot(aggr, w1na_ref[...], preferred_element_type=jnp.float32)
        + b1n_ref[...])
    out_ref[...] = (jnp.dot(hn, w2n_ref[...], preferred_element_type=jnp.float32)
                    + b2n_ref[...])


# ------------------------------ parameter initialization --------------------------
def init_linear(key, fan_in, fan_out):
    kw, kb = jax.random.split(key)
    bound = 1.0 / jnp.sqrt(jnp.float32(fan_in))
    w = jax.random.uniform(kw, (fan_in, fan_out), jnp.float32, -bound, bound)
    b = jax.random.uniform(kb, (1, fan_out), jnp.float32, -bound, bound)
    return w, b


def init_params(key, f_in, pos_dim, hidden, msg_out, f_out):
    """msg_net : Linear(2*f_in+pos_dim, hidden) - tanh - Linear(hidden, msg_out)
       aggr_net: Linear(f_in+msg_out, hidden)   - tanh - Linear(hidden, f_out)"""
    k1, k2, k3, k4 = jax.random.split(key, 4)
    w1e, b1e = init_linear(k1, 2 * f_in + pos_dim, hidden)
    w2e, b2e = init_linear(k2, hidden, msg_out)
    w1n, b1n = init_linear(k3, f_in + msg_out, hidden)
    w2n, b2n = init_linear(k4, hidden, f_out)
    return dict(w1e=w1e, b1e=b1e, w2e=w2e, b2e=b2e,
                w1n=w1n, b1n=b1n, w2n=w2n, b2n=b2n,
                f_in=f_in, pos_dim=pos_dim, hidden=hidden,
                msg_out=msg_out, f_out=f_out)


# ------------------- hoisted graph/param-dependent constants ---------------------
def prepare(params, edge_index, pos, num_nodes):
    """Everything that depends only on (graph, params): one-hot gather matrices,
    the 1/deg mean-scatter matrix, the fully precomputed position bias
    dpos @ W1_pos + b1, and padded/split weights. Computed once, reused across
    forward calls. flow='target_to_source' => i = edge_index[0] (aggregation
    node), j = edge_index[1]."""
    f_in, pos_dim = params["f_in"], params["pos_dim"]
    hidden, msg_out, f_out = params["hidden"], params["msg_out"], params["f_out"]

    row = edge_index[0].astype(jnp.int32)   # i
    col = edge_index[1].astype(jnp.int32)   # j
    E = row.shape[0]
    n_pad = _round_up(num_nodes, LANE)

    node_ids = jnp.arange(num_nodes, dtype=jnp.int32)
    grow = (row[:, None] == node_ids[None, :]).astype(jnp.float32)     # (E, N) one-hot of i
    gcol = (col[:, None] == node_ids[None, :]).astype(jnp.float32)     # (E, N) one-hot of j

    deg = grow.sum(axis=0)
    inv_deg = 1.0 / jnp.maximum(deg, 1.0)                              # scatter_mean: empty -> 0
    aggmat = grow.T * inv_deg[:, None]                                 # (N, E)

    dpos = jnp.take(pos, col, axis=0) - jnp.take(pos, row, axis=0)     # (E, pos_dim)

    fp = _round_up(f_in, LANE)
    hp = _round_up(hidden, LANE)
    mp = _round_up(msg_out, LANE)
    op = _round_up(f_out, LANE)

    w1e = params["w1e"]
    # msg_net layer-1 weight split across concat([x_i, x_j - x_i, pos_j - pos_i])
    w1e_xi = _pad2(w1e[:f_in], fp, hp)
    w1e_dx = _pad2(w1e[f_in:2 * f_in], fp, hp)
    # position term hoisted out of the kernel entirely: (E, hp) additive bias
    posb = _pad2(dpos @ w1e[2 * f_in:] + params["b1e"], E, hp)

    w1n = params["w1n"]
    return dict(
        grow=_pad2(grow, E, n_pad),
        gdiff=_pad2(gcol - grow, E, n_pad),
        posb=posb,
        aggmat=aggmat,
        w1e_xi=w1e_xi, w1e_dx=w1e_dx,
        w2e=_pad2(params["w2e"], hp, mp), b2e=_pad2(params["b2e"], 1, mp),
        w1nx=_pad2(w1n[:f_in], fp, hp), w1na=_pad2(w1n[f_in:], mp, hp),
        b1n=_pad2(params["b1n"], 1, hp),
        w2n=_pad2(params["w2n"], hp, op), b2n=_pad2(params["b2n"], 1, op),
        f_out=f_out, n_pad=n_pad)


# --------------------------------- forward wrapper --------------------------------
def mpnn_diff(x, prepared):
    """MPNNDiff.forward: one EdgeConvBase layer, fused into a single pallas_call."""
    x = x[:, None] if x.ndim == 1 else x               # x.unsqueeze(-1) if x.dim() == 1
    x = x.astype(jnp.float32)
    N = x.shape[0]
    assert N % 8 == 0, "N must be a multiple of 8 (pad nodes if not)"

    grow, gdiff, posb, aggmat = (prepared["grow"], prepared["gdiff"],
                                 prepared["posb"], prepared["aggmat"])
    E, n_pad = grow.shape
    fp, hp = prepared["w1nx"].shape
    mp = prepared["w2e"].shape[1]
    op = prepared["w2n"].shape[1]
    f_out = prepared["f_out"]

    # One node tile per TensorCore: grid=(1,) on v5e/v6e, grid=(2,) on v7x.
    # Bounds edge-MLP duplication to <= num_cores and maximizes MXU M-dim.
    cores = _num_tensorcores()
    tile_n = N // cores if (N % cores == 0 and (N // cores) % 8 == 0) else N
    grid = (N // tile_n,)

    xp = _pad2(x, n_pad, fp)
    # Fold the one-hot gathers into msg_net layer 1 (exact: one-hot selects rows).
    pxi = xp @ prepared["w1e_xi"]                      # (n_pad, hp), tiny
    pdx = xp @ prepared["w1e_dx"]                      # (n_pad, hp), tiny

    def whole(a):
        s = a.shape
        return pl.BlockSpec(s, lambda *_: (0,) * len(s))

    args = (xp, pxi, pdx, grow, gdiff, posb, aggmat,
            prepared["w2e"], prepared["b2e"],
            prepared["w1nx"], prepared["w1na"], prepared["b1n"],
            prepared["w2n"], prepared["b2n"])

    in_specs = [
        pl.BlockSpec((tile_n, fp), lambda i: (i, 0)),   # xp: node-tiled view for aggr_net
        whole(pxi), whole(pdx),
        whole(grow), whole(gdiff), whole(posb),
        pl.BlockSpec((tile_n, E), lambda i: (i, 0)),    # aggmat: node-tiled
        whole(prepared["w2e"]), whole(prepared["b2e"]),
        whole(prepared["w1nx"]), whole(prepared["w1na"]), whole(prepared["b1n"]),
        whole(prepared["w2n"]), whole(prepared["b2n"]),
    ]

    flops_per_step = 2 * (2 * E * n_pad * hp            # gather-fused msg_net layer 1
                          + E * hp * mp                 # msg_net layer 2
                          + tile_n * E * mp             # mean aggregation
                          + tile_n * fp * hp + tile_n * mp * hp  # aggr_net layer 1
                          + tile_n * hp * op)           # aggr_net layer 2
    transc_per_step = E * hp + tile_n * hp
    bytes_accessed = sum(int(a.size) * 4 for a in args) + N * op * 4

    out_p = pl.pallas_call(
        edgeconv_fused_kernel,
        out_shape=jax.ShapeDtypeStruct((N, op), jnp.float32),
        grid=grid,
        in_specs=in_specs,
        out_specs=pl.BlockSpec((tile_n, op), lambda i: (i, 0)),   # lane-dense (op == 128)
        compiler_params=pltpu.CompilerParams(
            dimension_semantics=("parallel",)),                   # shards the 2 tiles on v7x
        cost_estimate=pl.CostEstimate(
            flops=flops_per_step * grid[0],
            transcendentals=transc_per_step * grid[0],
            bytes_accessed=bytes_accessed),
    )(*args)

    return out_p[:, :f_out]                                        # drop lane padding


# ------------------------------- pure-JAX reference -------------------------------
def mpnn_diff_ref(x, edge_index, pos, params):
    x = x[:, None] if x.ndim == 1 else x
    row, col = edge_index[0], edge_index[1]          # i (aggregation node), j
    x_i, x_j = x[row], x[col]
    dpos = pos[col] - pos[row]
    inp = jnp.concatenate([x_i, x_j - x_i, dpos], axis=1)
    h = jnp.tanh(inp @ params["w1e"] + params["b1e"])
    msg = h @ params["w2e"] + params["b2e"]
    N = x.shape[0]
    summ = jnp.zeros((N, msg.shape[1]), jnp.float32).at[row].add(msg)
    cnt = jnp.zeros((N,), jnp.float32).at[row].add(1.0)
    aggr = summ / jnp.maximum(cnt, 1.0)[:, None]     # scatter_mean (empty rows -> 0)
    inp2 = jnp.concatenate([x, aggr], axis=1)
    hn = jnp.tanh(inp2 @ params["w1n"] + params["b1n"])
    return hn @ params["w2n"] + params["b2n"]


if __name__ == "__main__":
    N, E = 64, 256                       # nodes, directed edges
    F_IN, POS_DIM, HIDDEN, MSG, F_OUT = 1, 2, 32, 32, 1

    key = jax.random.PRNGKey(0)
    kx, kp, ke, kparam = jax.random.split(key, 4)

    x = jax.random.normal(kx, (N,), jnp.float32)                   # 1-D -> unsqueeze path
    pos = jax.random.uniform(kp, (N, POS_DIM), jnp.float32)
    edge_index = jax.random.randint(ke, (2, E), 0, N, jnp.int32)   # .long() handled via cast

    params = init_params(kparam, F_IN, POS_DIM, HIDDEN, MSG, F_OUT)
    prepared = prepare(params, edge_index, pos, N)                 # hoisted graph/param glue

    out = mpnn_diff(x, prepared)
    out = jax.block_until_ready(out)
    assert out.shape == (N, F_OUT) and out.dtype == jnp.float32

    ref = jax.block_until_ready(mpnn_diff_ref(x, edge_index, pos, params))
    np.testing.assert_allclose(np.asarray(out), np.asarray(ref), rtol=1e-4, atol=1e-4)

    print("KERNEL_OK")
</pallas_src>

<mosaic_0001>
module attributes {stable_mosaic.version = 11 : i64} {
  func.func @edgeconv_fused_kernel(%arg0: i32, %arg1: memref<64x128xf32, #tpu.memory_space<vmem>>, %arg2: memref<128x128xf32, #tpu.memory_space<vmem>>, %arg3: memref<128x128xf32, #tpu.memory_space<vmem>>, %arg4: memref<256x128xf32, #tpu.memory_space<vmem>>, %arg5: memref<256x128xf32, #tpu.memory_space<vmem>>, %arg6: memref<256x128xf32, #tpu.memory_space<vmem>>, %arg7: memref<64x256xf32, #tpu.memory_space<vmem>>, %arg8: memref<128x128xf32, #tpu.memory_space<vmem>>, %arg9: memref<1x128xf32, #tpu.memory_space<vmem>>, %arg10: memref<128x128xf32, #tpu.memory_space<vmem>>, %arg11: memref<128x128xf32, #tpu.memory_space<vmem>>, %arg12: memref<1x128xf32, #tpu.memory_space<vmem>>, %arg13: memref<128x128xf32, #tpu.memory_space<vmem>>, %arg14: memref<1x128xf32, #tpu.memory_space<vmem>>, %arg15: memref<64x128xf32, #tpu.memory_space<vmem>>) attributes {dimension_semantics = [#tpu.dimension_semantics<parallel>], iteration_bounds = array<i64: 1>, scalar_prefetch = 0 : i64, scratch_operands = 0 : i64, tpu.core_type = #tpu.core_type<tc>, window_params = [{transform_indices = @transform_0, window_bounds = array<i64: 64, 128>}, {pipeline_mode = #tpu.pipeline_mode<synchronous>, transform_indices = @transform_1, window_bounds = array<i64: 128, 128>}, {pipeline_mode = #tpu.pipeline_mode<synchronous>, transform_indices = @transform_2, window_bounds = array<i64: 128, 128>}, {pipeline_mode = #tpu.pipeline_mode<synchronous>, transform_indices = @transform_3, window_bounds = array<i64: 256, 128>}, {pipeline_mode = #tpu.pipeline_mode<synchronous>, transform_indices = @transform_4, window_bounds = array<i64: 256, 128>}, {pipeline_mode = #tpu.pipeline_mode<synchronous>, transform_indices = @transform_5, window_bounds = array<i64: 256, 128>}, {transform_indices = @transform_6, window_bounds = array<i64: 64, 256>}, {pipeline_mode = #tpu.pipeline_mode<synchronous>, transform_indices = @transform_7, window_bounds = array<i64: 128, 128>}, {pipeline_mode = #tpu.pipeline_mode<synchronous>, transform_indices = @transform_8, window_bounds = array<i64: 1, 128>}, {pipeline_mode = #tpu.pipeline_mode<synchronous>, transform_indices = @transform_9, window_bounds = array<i64: 128, 128>}, {pipeline_mode = #tpu.pipeline_mode<synchronous>, transform_indices = @transform_10, window_bounds = array<i64: 128, 128>}, {pipeline_mode = #tpu.pipeline_mode<synchronous>, transform_indices = @transform_11, window_bounds = array<i64: 1, 128>}, {pipeline_mode = #tpu.pipeline_mode<synchronous>, transform_indices = @transform_12, window_bounds = array<i64: 128, 128>}, {pipeline_mode = #tpu.pipeline_mode<synchronous>, transform_indices = @transform_13, window_bounds = array<i64: 1, 128>}, {transform_indices = @transform_14, window_bounds = array<i64: 64, 128>}]} {
    %c0 = arith.constant 0 : index
    %c0_0 = arith.constant 0 : index
    %0 = vector.load %arg4[%c0, %c0_0] : memref<256x128xf32, #tpu.memory_space<vmem>>, vector<256x128xf32>
    %c0_1 = arith.constant 0 : index
    %c0_2 = arith.constant 0 : index
    %1 = vector.load %arg2[%c0_1, %c0_2] : memref<128x128xf32, #tpu.memory_space<vmem>>, vector<128x128xf32>
    %cst = arith.constant dense<0.000000e+00> : vector<256x128xf32>
    %2 = tpu.matmul %0, %1, %cst {dimension_numbers = #tpu.dot_dimension_numbers<[1], [0], [0], [1], [0, 0, 1, 1], [], []>} : vector<256x128xf32>, vector<128x128xf32>, vector<256x128xf32> -> vector<256x128xf32>
    %c0_3 = arith.constant 0 : index
    %c0_4 = arith.constant 0 : index
    %3 = vector.load %arg5[%c0_3, %c0_4] : memref<256x128xf32, #tpu.memory_space<vmem>>, vector<256x128xf32>
    %c0_5 = arith.constant 0 : index
    %c0_6 = arith.constant 0 : index
    %4 = vector.load %arg3[%c0_5, %c0_6] : memref<128x128xf32, #tpu.memory_space<vmem>>, vector<128x128xf32>
    %cst_7 = arith.constant dense<0.000000e+00> : vector<256x128xf32>
    %5 = tpu.matmul %3, %4, %cst_7 {dimension_numbers = #tpu.dot_dimension_numbers<[1], [0], [0], [1], [0, 0, 1, 1], [], []>} : vector<256x128xf32>, vector<128x128xf32>, vector<256x128xf32> -> vector<256x128xf32>
    %6 = arith.addf %2, %5 : vector<256x128xf32>
    %c0_8 = arith.constant 0 : index
    %c0_9 = arith.constant 0 : index
    %7 = vector.load %arg6[%c0_8, %c0_9] : memref<256x128xf32, #tpu.memory_space<vmem>>, vector<256x128xf32>
    %8 = arith.addf %6, %7 : vector<256x128xf32>
    %9 = math.tanh %8 : vector<256x128xf32>
    %c0_10 = arith.constant 0 : index
    %c0_11 = arith.constant 0 : index
    %10 = vector.load %arg8[%c0_10, %c0_11] : memref<128x128xf32, #tpu.memory_space<vmem>>, vector<128x128xf32>
    %cst_12 = arith.constant dense<0.000000e+00> : vector<256x128xf32>
    %11 = tpu.matmul %9, %10, %cst_12 {dimension_numbers = #tpu.dot_dimension_numbers<[1], [0], [0], [1], [0, 0, 1, 1], [], []>} : vector<256x128xf32>, vector<128x128xf32>, vector<256x128xf32> -> vector<256x128xf32>
    %c0_13 = arith.constant 0 : index
    %c0_14 = arith.constant 0 : index
    %12 = vector.load %arg9[%c0_13, %c0_14] : memref<1x128xf32, #tpu.memory_space<vmem>>, vector<1x128xf32>
    %13 = vector.broadcast %12 : vector<1x128xf32> to vector<256x128xf32>
    %14 = arith.addf %11, %13 : vector<256x128xf32>
    %c0_15 = arith.constant 0 : index
    %c0_16 = arith.constant 0 : index
    %15 = vector.load %arg7[%c0_15, %c0_16] : memref<64x256xf32, #tpu.memory_space<vmem>>, vector<64x256xf32>
    %cst_17 = arith.constant dense<0.000000e+00> : vector<64x128xf32>
    %16 = tpu.matmul %15, %14, %cst_17 {dimension_numbers = #tpu.dot_dimension_numbers<[1], [0], [0], [1], [0, 0, 1, 1], [], []>} : vector<64x256xf32>, vector<256x128xf32>, vector<64x128xf32> -> vector<64x128xf32>
    %c0_18 = arith.constant 0 : index
    %c0_19 = arith.constant 0 : index
    %17 = vector.load %arg1[%c0_18, %c0_19] : memref<64x128xf32, #tpu.memory_space<vmem>>, vector<64x128xf32>
    %c0_20 = arith.constant 0 : index
    %c0_21 = arith.constant 0 : index
    %18 = vector.load %arg10[%c0_20, %c0_21] : memref<128x128xf32, #tpu.memory_space<vmem>>, vector<128x128xf32>
    %cst_22 = arith.constant dense<0.000000e+00> : vector<64x128xf32>
    %19 = tpu.matmul %17, %18, %cst_22 {dimension_numbers = #tpu.dot_dimension_numbers<[1], [0], [0], [1], [0, 0, 1, 1], [], []>} : vector<64x128xf32>, vector<128x128xf32>, vector<64x128xf32> -> vector<64x128xf32>
    %c0_23 = arith.constant 0 : index
    %c0_24 = arith.constant 0 : index
    %20 = vector.load %arg11[%c0_23, %c0_24] : memref<128x128xf32, #tpu.memory_space<vmem>>, vector<128x128xf32>
    %cst_25 = arith.constant dense<0.000000e+00> : vector<64x128xf32>
    %21 = tpu.matmul %16, %20, %cst_25 {dimension_numbers = #tpu.dot_dimension_numbers<[1], [0], [0], [1], [0, 0, 1, 1], [], []>} : vector<64x128xf32>, vector<128x128xf32>, vector<64x128xf32> -> vector<64x128xf32>
    %22 = arith.addf %19, %21 : vector<64x128xf32>
    %c0_26 = arith.constant 0 : index
    %c0_27 = arith.constant 0 : index
    %23 = vector.load %arg12[%c0_26, %c0_27] : memref<1x128xf32, #tpu.memory_space<vmem>>, vector<1x128xf32>
    %24 = vector.broadcast %23 : vector<1x128xf32> to vector<64x128xf32>
    %25 = arith.addf %22, %24 : vector<64x128xf32>
    %26 = math.tanh %25 : vector<64x128xf32>
    %c0_28 = arith.constant 0 : index
    %c0_29 = arith.constant 0 : index
    %27 = vector.load %arg13[%c0_28, %c0_29] : memref<128x128xf32, #tpu.memory_space<vmem>>, vector<128x128xf32>
    %cst_30 = arith.constant dense<0.000000e+00> : vector<64x128xf32>
    %28 = tpu.matmul %26, %27, %cst_30 {dimension_numbers = #tpu.dot_dimension_numbers<[1], [0], [0], [1], [0, 0, 1, 1], [], []>} : vector<64x128xf32>, vector<128x128xf32>, vector<64x128xf32> -> vector<64x128xf32>
    %c0_31 = arith.constant 0 : index
    %c0_32 = arith.constant 0 : index
    %29 = vector.load %arg14[%c0_31, %c0_32] : memref<1x128xf32, #tpu.memory_space<vmem>>, vector<1x128xf32>
    %30 = vector.broadcast %29 : vector<1x128xf32> to vector<64x128xf32>
    %31 = arith.addf %28, %30 : vector<64x128xf32>
    %c0_33 = arith.constant 0 : index
    %c0_34 = arith.constant 0 : index
    %32 = vector.load %arg15[%c0_33, %c0_34] : memref<64x128xf32, #tpu.memory_space<vmem>>, vector<64x128xf32>
    tpu.vector_store %arg15[%c0_33, %c0_34], %31 {strides = array<i32>} : memref<64x128xf32, #tpu.memory_space<vmem>>, vector<64x128xf32>,
    return
  }
  func.func @transform_0(%arg0: i32) -> (i32, i32) {
    %c0_i32 = arith.constant 0 : i32
    %c0_i32_0 = arith.constant 0 : i32
    return %arg0, %c0_i32 : i32, i32
  }
  func.func @transform_1(%arg0: i32) -> (i32, i32) {
    %c0_i32 = arith.constant 0 : i32
    %c0_i32_0 = arith.constant 0 : i32
    %c0_i32_1 = arith.constant 0 : i32
    return %c0_i32, %c0_i32_0 : i32, i32
  }
  func.func @transform_2(%arg0: i32) -> (i32, i32) {
    %c0_i32 = arith.constant 0 : i32
    %c0_i32_0 = arith.constant 0 : i32
    %c0_i32_1 = arith.constant 0 : i32
    return %c0_i32, %c0_i32_0 : i32, i32
  }
  func.func @transform_3(%arg0: i32) -> (i32, i32) {
    %c0_i32 = arith.constant 0 : i32
    %c0_i32_0 = arith.constant 0 : i32
    %c0_i32_1 = arith.constant 0 : i32
    return %c0_i32, %c0_i32_0 : i32, i32
  }
  func.func @transform_4(%arg0: i32) -> (i32, i32) {
    %c0_i32 = arith.constant 0 : i32
    %c0_i32_0 = arith.constant 0 : i32
    %c0_i32_1 = arith.constant 0 : i32
    return %c0_i32, %c0_i32_0 : i32, i32
  }
  func.func @transform_5(%arg0: i32) -> (i32, i32) {
    %c0_i32 = arith.constant 0 : i32
    %c0_i32_0 = arith.constant 0 : i32
    %c0_i32_1 = arith.constant 0 : i32
    return %c0_i32, %c0_i32_0 : i32, i32
  }
  func.func @transform_6(%arg0: i32) -> (i32, i32) {
    %c0_i32 = arith.constant 0 : i32
    %c0_i32_0 = arith.constant 0 : i32
    return %arg0, %c0_i32 : i32, i32
  }
  func.func @transform_7(%arg0: i32) -> (i32, i32) {
    %c0_i32 = arith.constant 0 : i32
    %c0_i32_0 = arith.constant 0 : i32
    %c0_i32_1 = arith.constant 0 : i32
    return %c0_i32, %c0_i32_0 : i32, i32
  }
  func.func @transform_8(%arg0: i32) -> (i32, i32) {
    %c0_i32 = arith.constant 0 : i32
    %c0_i32_0 = arith.constant 0 : i32
    %c0_i32_1 = arith.constant 0 : i32
    return %c0_i32, %c0_i32_0 : i32, i32
  }
  func.func @transform_9(%arg0: i32) -> (i32, i32) {
    %c0_i32 = arith.constant 0 : i32
    %c0_i32_0 = arith.constant 0 : i32
    %c0_i32_1 = arith.constant 0 : i32
    return %c0_i32, %c0_i32_0 : i32, i32
  }
  func.func @transform_10(%arg0: i32) -> (i32, i32) {
    %c0_i32 = arith.constant 0 : i32
    %c0_i32_0 = arith.constant 0 : i32
    %c0_i32_1 = arith.constant 0 : i32
    return %c0_i32, %c0_i32_0 : i32, i32
  }
  func.func @transform_11(%arg0: i32) -> (i32, i32) {
    %c0_i32 = arith.constant 0 : i32
    %c0_i32_0 = arith.constant 0 : i32
    %c0_i32_1 = arith.constant 0 : i32
    return %c0_i32, %c0_i32_0 : i32, i32
  }
  func.func @transform_12(%arg0: i32) -> (i32, i32) {
    %c0_i32 = arith.constant 0 : i32
    %c0_i32_0 = arith.constant 0 : i32
    %c0_i32_1 = arith.constant 0 : i32
    return %c0_i32, %c0_i32_0 : i32, i32
  }
  func.func @transform_13(%arg0: i32) -> (i32, i32) {
    %c0_i32 = arith.constant 0 : i32
    %c0_i32_0 = arith.constant 0 : i32
    %c0_i32_1 = arith.constant 0 : i32
    return %c0_i32, %c0_i32_0 : i32, i32
  }
  func.func @transform_14(%arg0: i32) -> (i32, i32) {
    %c0_i32 = arith.constant 0 : i32
    %c0_i32_0 = arith.constant 0 : i32
    return %arg0, %c0_i32 : i32, i32
  }
}

</mosaic_0001>

<bundles_post_ra>
// kernel: tpu_custom_call.1
= control target key start
LH: loop header
LB: loop body
LE: loop exit
PB: predicated region body
PF: predicated region fallthrough
CT: control target
= control target key end

     0   :  { %19 = vsyncpa [#allocation3], 0  ;;  %s3272_s0 = inlined_call_operand.hbm [shape: f32[128,128], index: 0, kind: input, shape index: {}]   ;;  %s3273_s1 = inlined_call_operand.hbm [shape: f32[128,128], index: 1, kind: input, shape index: {}]   ;;  %s3274_s2 = inlined_call_operand.hbm [shape: f32[128,128], index: 2, kind: input, shape index: {}]   ;;  %s3275_s3 = inlined_call_operand.hbm [shape: f32[256,128], index: 3, kind: input, shape index: {}]   ;;  %s3276_s4 = inlined_call_operand.hbm [shape: f32[256,128], index: 4, kind: input, shape index: {}]   ;;  %s3277_s5 = inlined_call_operand.hbm [shape: f32[256,128], index: 5, kind: input, shape index: {}]   ;;  %s3278_s6 = inlined_call_operand.hbm [shape: f32[64,256], index: 6, kind: input, shape index: {}]   ;;  %s3279_s7 = inlined_call_operand.hbm [shape: f32[128,128], index: 7, kind: input, shape index: {}]   ;;  %s3280_s8 = inlined_call_operand.vmem [shape: f32[1,128], index: 8, kind: input, shape index: {}]   ;;  %s3281_s9 = inlined_call_operand.hbm [shape: f32[128,128], index: 9, kind: input, shape index: {}]   ;;  %s3282_s10 = inlined_call_operand.hbm [shape: f32[128,128], index: 10, kind: input, shape index: {}]   ;;  %s3283_s11 = inlined_call_operand.vmem [shape: f32[1,128], index: 11, kind: input, shape index: {}]   ;;  %s3284_s12 = inlined_call_operand.hbm [shape: f32[128,128], index: 12, kind: input, shape index: {}]   ;;  %s3285_s13 = inlined_call_operand.vmem [shape: f32[1,128], index: 13, kind: input, shape index: {}]   ;;  %s3286_s14 = inlined_call_operand.hbm [shape: f32[64,128], index: 14, kind: output, shape index: {}]  }
   0x1   :  { %20 = vsyncpa [#allocation6], 0 }
   0x2   :  { %21 = vsyncpa [#allocation9], 0 }
   0x3   :  { %22 = vsyncpa [#allocation12], 0 }
   0x4   :  { %23 = vsyncpa [#allocation15], 0 }
   0x5   :  { %24 = vsyncpa [#allocation18], 0 }
   0x6   :  { %25 = vsyncpa [#allocation4], 0  ;;  %s2924_s29 = smov [#allocation5]   ;;  %s2925_s15 = smov [#allocation8]  }
   0x7   :  { %s43_s30 = sshll.u32 %s2924_s29, 4  ;;  %s67_s16 = sshll.u32 %s2925_s15, 4  ;;  %s44_s30 = int_to_ptr.vmem [resolvable:$true] %s43_s30  ;;  %s3015_s16 = int_to_ptr.vmem [resolvable:$true] %s67_s16 }
   0x8   :  { %s2646_s19 = scalar_lea.hbm %s3273_s1, 2048 }
   0x9   :  { %p2647_p0 = scmp.ne.s32.totalorder %s3273_s1, %s2646_s19  ;;  %p2650_p1 = scmp.lt.u32.totalorder %s2646_s19, %s3273_s1 }
   0xb   :  { %p2652_p2 = pnand %p2650_p1, %p2647_p0 }
   0xd   :  { %2655 = shalt.err (!%p2652_p2)
}
   0xe   :  { %s2656_s24 = scalar_lea.vmem %s44_s30, 2048  ;;  %p2661_p4 = scmp.lt.s32.totalorder %s44_s30, %s44_s30 }
   0xf   :  { %p2657_p3 = scmp.ne.s32.totalorder %s44_s30, %s2656_s24  ;;  %p2662_p5 = scmp.lt.s32.totalorder %s2656_s24, %s2656_s24 }
  0x11   :  { %p2663_p6 = por %p2662_p5, %p2661_p4 }
  0x13   :  { %p2664_p7 = pnand %p2663_p6, %p2657_p3 }
  0x15   :  { %2667 = shalt.err (!%p2664_p7)
}
  0x16   :  { %s2926_s25 = smov 128   ;;  %s2927_s26 = smov 8  }
  0x17   :  { %49 = dma.hbm_to_vmem [thread:$0]  %s3273_s1, 2048, %s44_s30, [#allocation6], %s2926_s25, %s2926_s25, %s2927_s26  }
  0x18   :  { %s2668_s17 = scalar_lea.hbm %s3275_s3, 4096 }
  0x19   :  { %p2669_p8 = scmp.ne.s32.totalorder %s3275_s3, %s2668_s17  ;;  %p2672_p9 = scmp.lt.u32.totalorder %s2668_s17, %s3275_s3 }
  0x1b   :  { %p2674_p10 = pnand %p2672_p9, %p2669_p8 }
  0x1d   :  { %2677 = shalt.err (!%p2674_p10)
}
  0x1e   :  { %s2678_s22 = scalar_lea.vmem %s3015_s16, 4096  ;;  %p2683_p12 = scmp.lt.s32.totalorder %s3015_s16, %s3015_s16 }
  0x1f   :  { %p2679_p11 = scmp.ne.s32.totalorder %s3015_s16, %s2678_s22  ;;  %p2684_p13 = scmp.lt.s32.totalorder %s2678_s22, %s2678_s22 }
  0x21   :  { %p2685_p0 = por %p2684_p13, %p2683_p12 }
  0x23   :  { %p2686_p1 = pnand %p2685_p0, %p2679_p11 }
  0x25   :  { %2689 = shalt.err (!%p2686_p1)
}
  0x26   :  { %73 = dma.hbm_to_vmem [thread:$0]  %s3275_s3, 4096, %s3015_s16, [#allocation9], %s2926_s25, %s2926_s25, %s2927_s26  }
  0x27   :  { %s2928_s23 = smov [#allocation11]   ;;  %s2929_s27 = smov [#allocation14]  }
  0x28   :  { %s91_s24 = sshll.u32 %s2928_s23, 4  ;;  %s115_s28 = sshll.u32 %s2929_s27, 4  ;;  %s92_s24 = int_to_ptr.vmem [resolvable:$true] %s91_s24  ;;  %s3052_s28 = int_to_ptr.vmem [resolvable:$true] %s115_s28 }
  0x29   :  { %s2690_s17 = scalar_lea.hbm %s3277_s5, 4096 }
  0x2a   :  { %p2691_p2 = scmp.ne.s32.totalorder %s3277_s5, %s2690_s17  ;;  %p2694_p3 = scmp.lt.u32.totalorder %s2690_s17, %s3277_s5 }
  0x2c   :  { %p2696_p4 = pnand %p2694_p3, %p2691_p2 }
  0x2e   :  { %2699 = shalt.err (!%p2696_p4)
}
  0x2f   :  { %s2700_s3 = scalar_lea.vmem %s92_s24, 4096  ;;  %p2705_p6 = scmp.lt.s32.totalorder %s92_s24, %s92_s24 }
  0x30   :  { %p2701_p5 = scmp.ne.s32.totalorder %s92_s24, %s2700_s3  ;;  %p2706_p7 = scmp.lt.s32.totalorder %s2700_s3, %s2700_s3 }
  0x32   :  { %p2707_p8 = por %p2706_p7, %p2705_p6 }
  0x34   :  { %p2708_p9 = pnand %p2707_p8, %p2701_p5 }
  0x36   :  { %2711 = shalt.err (!%p2708_p9)
}
  0x37   :  { %97 = dma.hbm_to_vmem [thread:$0]  %s3277_s5, 4096, %s92_s24, [#allocation12], %s2926_s25, %s2926_s25, %s2927_s26  }
  0x38   :  { %s2712_s23 = scalar_lea.hbm %s3279_s7, 2048 }
  0x39   :  { %p2713_p10 = scmp.ne.s32.totalorder %s3279_s7, %s2712_s23  ;;  %p2716_p11 = scmp.lt.u32.totalorder %s2712_s23, %s3279_s7 }
  0x3b   :  { %p2718_p12 = pnand %p2716_p11, %p2713_p10 }
  0x3d   :  { %2721 = shalt.err (!%p2718_p12)
}
  0x3e   :  { %s2722_s18 = scalar_lea.vmem %s3052_s28, 2048  ;;  %p2727_p0 = scmp.lt.s32.totalorder %s3052_s28, %s3052_s28 }
  0x3f   :  { %p2723_p13 = scmp.ne.s32.totalorder %s3052_s28, %s2722_s18  ;;  %p2728_p1 = scmp.lt.s32.totalorder %s2722_s18, %s2722_s18 }
  0x41   :  { %p2729_p2 = por %p2728_p1, %p2727_p0 }
  0x43   :  { %p2730_p3 = pnand %p2729_p2, %p2723_p13 }
  0x45   :  { %2733 = shalt.err (!%p2730_p3)
}
  0x46   :  { %121 = dma.hbm_to_vmem [thread:$0]  %s3279_s7, 2048, %s3052_s28, [#allocation15], %s2926_s25, %s2926_s25, %s2927_s26  }
  0x47   :  { %s2930_s19 = smov [#allocation17]   ;;  %s2931_s21 = smov [#allocation2]  }
  0x48   :  { %s141_s20 = sshll.u32 %s2930_s19, 4  ;;  %s31_s3 = sshll.u32 %s2931_s21, 4  ;;  %s142_s20 = int_to_ptr.vmem [resolvable:$true] %s141_s20  ;;  %s3089_s3 = int_to_ptr.vmem [resolvable:$true] %s31_s3 }
  0x49   :  { %s2734_s1 = scalar_lea.hbm %s3282_s10, 2048 }
  0x4a   :  { %p2735_p4 = scmp.ne.s32.totalorder %s3282_s10, %s2734_s1  ;;  %p2738_p5 = scmp.lt.u32.totalorder %s2734_s1, %s3282_s10 }
  0x4c   :  { %p2740_p6 = pnand %p2738_p5, %p2735_p4 }
  0x4e   :  { %2743 = shalt.err (!%p2740_p6)
}
  0x4f   :  { %s2744_s7 = scalar_lea.vmem %s142_s20, 2048  ;;  %p2749_p8 = scmp.lt.s32.totalorder %s142_s20, %s142_s20 }
  0x50   :  { %p2745_p7 = scmp.ne.s32.totalorder %s142_s20, %s2744_s7  ;;  %p2750_p9 = scmp.lt.s32.totalorder %s2744_s7, %s2744_s7 }
  0x52   :  { %p2751_p10 = por %p2750_p9, %p2749_p8 }
  0x54   :  { %p2752_p11 = pnand %p2751_p10, %p2745_p7 }
  0x56   :  { %2755 = shalt.err (!%p2752_p11)
}
  0x57   :  { %147 = dma.hbm_to_vmem [thread:$0]  %s3282_s10, 2048, %s142_s20, [#allocation18], %s2926_s25, %s2926_s25, %s2927_s26  }
  0x58   :  { %s2756_s5 = scalar_lea.hbm %s3272_s0, 1024  ;;  %s2758_s22 = scalar_lea.hbm %s3272_s0, 2048 }
  0x59   :  { %p2757_p12 = scmp.ne.s32.totalorder %s3272_s0, %s2756_s5  ;;  %p2759_p13 = scmp.lt.u32.totalorder %s2758_s22, %s2756_s5 }
  0x5a   :  { %p2760_p0 = scmp.lt.u32.totalorder %s2756_s5, %s3272_s0 }
  0x5c   :  { %p2761_p1 = por %p2760_p0, %p2759_p13 }
  0x5e   :  { %p2762_p2 = pnand %p2761_p1, %p2757_p12 }
  0x60   :  { %2765 = shalt.err (!%p2762_p2)
}
  0x61   :  { %s2766_s10 = scalar_lea.vmem %s3089_s3, 1024  ;;  %p2771_p4 = scmp.lt.s32.totalorder %s3089_s3, %s3089_s3 }
  0x62   :  { %p2767_p3 = scmp.ne.s32.totalorder %s3089_s3, %s2766_s10  ;;  %p2772_p5 = scmp.lt.s32.totalorder %s2766_s10, %s2766_s10 }
  0x64   :  { %p2773_p6 = por %p2772_p5, %p2771_p4 }
  0x66   :  { %p2774_p7 = pnand %p2773_p6, %p2767_p3 }
  0x68   :  { %2777 = shalt.err (!%p2774_p7)
}
  0x69   :  { %37 = dma.hbm_to_vmem [thread:$0]  %s3272_s0, 1024, %s3089_s3, [#allocation3], %s2926_s25, %s2926_s25, %s2927_s26  }
  0x6a   :  { %s2932_s27 = smov [#allocation7]   ;;  %s2933_s7 = smov [#allocation10]  }
  0x6b   :  { %s55_s29 = sshll.u32 %s2932_s27, 4  ;;  %s79_s28 = sshll.u32 %s2933_s7, 4  ;;  %s56_s29 = int_to_ptr.vmem [resolvable:$true] %s55_s29  ;;  %s3129_s28 = int_to_ptr.vmem [resolvable:$true] %s79_s28 }
  0x6c   :  { %s2778_s18 = scalar_lea.hbm %s3274_s2, 2048 }
  0x6d   :  { %p2779_p8 = scmp.ne.s32.totalorder %s3274_s2, %s2778_s18  ;;  %p2782_p9 = scmp.lt.u32.totalorder %s2778_s18, %s3274_s2 }
  0x6f   :  { %p2784_p10 = pnand %p2782_p9, %p2779_p8 }
  0x71   :  { %2787 = shalt.err (!%p2784_p10)
}
  0x72   :  { %s2788_s0 = scalar_lea.vmem %s56_s29, 2048  ;;  %p2793_p12 = scmp.lt.s32.totalorder %s56_s29, %s56_s29 }
  0x73   :  { %p2789_p11 = scmp.ne.s32.totalorder %s56_s29, %s2788_s0  ;;  %p2794_p13 = scmp.lt.s32.totalorder %s2788_s0, %s2788_s0 }
  0x75   :  { %p2795_p0 = por %p2794_p13, %p2793_p12 }
  0x77   :  { %p2796_p1 = pnand %p2795_p0, %p2789_p11 }
  0x79   :  { %2799 = shalt.err (!%p2796_p1)
}
  0x7a   :  { %61 = dma.hbm_to_vmem [thread:$0]  %s3274_s2, 2048, %s56_s29, [#allocation6], %s2926_s25, %s2926_s25, %s2927_s26  }
  0x7b   :  { %s2800_s30 = scalar_lea.hbm %s3276_s4, 4096 }
  0x7c   :  { %p2801_p2 = scmp.ne.s32.totalorder %s3276_s4, %s2800_s30  ;;  %p2804_p3 = scmp.lt.u32.totalorder %s2800_s30, %s3276_s4 }
  0x7e   :  { %p2806_p4 = pnand %p2804_p3, %p2801_p2 }
  0x80   :  { %2809 = shalt.err (!%p2806_p4)
}
  0x81   :  { %s2810_s7 = scalar_lea.vmem %s3129_s28, 4096  ;;  %p2815_p6 = scmp.lt.s32.totalorder %s3129_s28, %s3129_s28 }
  0x82   :  { %p2811_p5 = scmp.ne.s32.totalorder %s3129_s28, %s2810_s7  ;;  %p2816_p7 = scmp.lt.s32.totalorder %s2810_s7, %s2810_s7 }
  0x84   :  { %p2817_p8 = por %p2816_p7, %p2815_p6 }
  0x86   :  { %p2818_p9 = pnand %p2817_p8, %p2811_p5 }
  0x88   :  { %2821 = shalt.err (!%p2818_p9)
}
  0x89   :  { %85 = dma.hbm_to_vmem [thread:$0]  %s3276_s4, 4096, %s3129_s28, [#allocation9], %s2926_s25, %s2926_s25, %s2927_s26  }
  0x8a   :  { %s2934_s15 = smov [#allocation13]   ;;  %s2822_s24 = scalar_lea.hbm %s3278_s6, 2048 }
  0x8b   :  { %s103_s17 = sshll.u32 %s2934_s15, 4  ;;  %p2823_p10 = scmp.ne.s32.totalorder %s3278_s6, %s2822_s24  ;;  %s104_s17 = int_to_ptr.vmem [resolvable:$true] %s103_s17 }
  0x8c   :  { %p2826_p11 = scmp.lt.u32.totalorder %s2822_s24, %s3278_s6 }
  0x8e   :  { %p2828_p12 = pnand %p2826_p11, %p2823_p10 }
  0x90   :  { %2831 = shalt.err (!%p2828_p12)
}
  0x91   :  { %s2832_s16 = scalar_lea.vmem %s104_s17, 2048  ;;  %p2837_p0 = scmp.lt.s32.totalorder %s104_s17, %s104_s17 }
  0x92   :  { %p2833_p13 = scmp.ne.s32.totalorder %s104_s17, %s2832_s16  ;;  %p2838_p1 = scmp.lt.s32.totalorder %s2832_s16, %s2832_s16 }
  0x94   :  { %p2839_p2 = por %p2838_p1, %p2837_p0 }
  0x96   :  { %p2840_p3 = pnand %p2839_p2, %p2833_p13 }
  0x98   :  { %2843 = shalt.err (!%p2840_p3)
}
  0x99   :  { %s2935_s4 = smov 256   ;;  %s2936_s28 = smov 16  }
  0x9a   :  { %109 = dma.hbm_to_vmem [thread:$0]  %s3278_s6, 2048, %s104_s17, [#allocation12], %s2935_s4, %s2935_s4, %s2936_s28  }
  0x9b   :  { %s2937_s30 = smov [#allocation16]   ;;  %s2938_s20 = smov [#allocation19]  }
  0x9c   :  { %s129_s10 = sshll.u32 %s2937_s30, 4  ;;  %s155_s23 = sshll.u32 %s2938_s20, 4  ;;  %s130_s10 = int_to_ptr.vmem [resolvable:$true] %s129_s10  ;;  %s156_s23 = int_to_ptr.vmem [resolvable:$true] %s155_s23 }
  0x9d   :  { %s2844_s2 = scalar_lea.hbm %s3281_s9, 2048 }
  0x9e   :  { %p2845_p4 = scmp.ne.s32.totalorder %s3281_s9, %s2844_s2  ;;  %p2848_p5 = scmp.lt.u32.totalorder %s2844_s2, %s3281_s9 }
  0xa0   :  { %p2850_p6 = pnand %p2848_p5, %p2845_p4 }
  0xa2   :  { %2853 = shalt.err (!%p2850_p6)
}
  0xa3   :  { %s2854_s6 = scalar_lea.vmem %s130_s10, 2048  ;;  %p2859_p8 = scmp.lt.s32.totalorder %s130_s10, %s130_s10 }
  0xa4   :  { %p2855_p7 = scmp.ne.s32.totalorder %s130_s10, %s2854_s6  ;;  %p2860_p9 = scmp.lt.s32.totalorder %s2854_s6, %s2854_s6 }
  0xa6   :  { %p2861_p10 = por %p2860_p9, %p2859_p8 }
  0xa8   :  { %p2862_p11 = pnand %p2861_p10, %p2855_p7 }
  0xaa   :  { %2865 = shalt.err (!%p2862_p11)
}
  0xab   :  { %135 = dma.hbm_to_vmem [thread:$0]  %s3281_s9, 2048, %s130_s10, [#allocation15], %s2926_s25, %s2926_s25, %s2927_s26  }
  0xac   :  { %s2866_s0 = scalar_lea.hbm %s3284_s12, 2048 }
  0xad   :  { %p2867_p12 = scmp.ne.s32.totalorder %s3284_s12, %s2866_s0  ;;  %p2870_p13 = scmp.lt.u32.totalorder %s2866_s0, %s3284_s12 }
  0xaf   :  { %p2872_p0 = pnand %p2870_p13, %p2867_p12 }
  0xb1   :  { %2875 = shalt.err (!%p2872_p0)
}
  0xb2   :  { %s2876_s22 = scalar_lea.vmem %s156_s23, 2048  ;;  %p2881_p2 = scmp.lt.s32.totalorder %s156_s23, %s156_s23 }
  0xb3   :  { %p2877_p1 = scmp.ne.s32.totalorder %s156_s23, %s2876_s22  ;;  %p2882_p3 = scmp.lt.s32.totalorder %s2876_s22, %s2876_s22 }
  0xb5   :  { %p2883_p4 = por %p2882_p3, %p2881_p2 }
  0xb7   :  { %p2884_p5 = pnand %p2883_p4, %p2877_p1 }
  0xb9   :  { %2887 = shalt.err (!%p2884_p5)
}
  0xba   :  { %161 = dma.hbm_to_vmem [thread:$0]  %s3284_s12, 2048, %s156_s23, [#allocation18], %s2926_s25, %s2926_s25, %s2927_s26  }
  0xbb   :  { %2910 = dma.done.wait [#allocation3], 1024  }
  0xbc   :  { %2911 = vsyncadd [#allocation3], 4294966272 }
  0xbd   :  { %2912 = dma.done.wait [#allocation6], 4096  }
  0xbe   :  { %2913 = vsyncadd [#allocation6], 4294963200 }
  0xbf   :  { %2914 = dma.done.wait [#allocation9], 8192  }
  0xc0   :  { %2915 = vsyncadd [#allocation9], 4294959104 }
  0xc1   :  { %2916 = dma.done.wait [#allocation12], 6144  }
  0xc2   :  { %2917 = vsyncadd [#allocation12], 4294961152 }
  0xc3   :  { %2918 = dma.done.wait [#allocation15], 4096  }
  0xc4   :  { %2919 = vsyncadd [#allocation15], 4294963200 }
  0xc5   :  { %2920 = dma.done.wait [#allocation18], 4096  }
  0xc6   :  { %2921 = vsyncadd [#allocation18], 4294963200  ;;  %v277_v0 = vld [vmem:[#allocation7] sm:$0xff]  ;;  %v278_v1 = vld [vmem:[#allocation7 + $0x8] sm:$0xff]  ;;  %s2939_s23 = smov [#allocation20]  }
  0xc7   :  { %v279_v2 = vld [vmem:[#allocation7 + $0x10] sm:$0xff]  ;;  %v2286_v3 = vpack.c.bf16 %v278_v1, %v277_v0  ;;  %v280_v4 = vld [vmem:[#allocation7 + $0x18] sm:$0xff]  ;;  %v281_v6 = vld [vmem:[#allocation7 + $0x20] sm:$0xff]  ;;  %s1622_s27 = sshll.u32 %s2939_s23, 4  ;;  %s1623_s27 = int_to_ptr.vmem [resolvable:$true] %s1622_s27 }
  0xc8   :  { %v2290_v5 = vpack.c.bf16 %v280_v4, %v279_v2  ;;  %v282_v7 = vld [vmem:[#allocation7 + $0x28] sm:$0xff]  ;;  %v245_v9 = vld [vmem:[#allocation10] sm:$0xff]  ;;  %v283_v10 = vld [vmem:[#allocation7 + $0x30] sm:$0xff]  ;;  %p2893_p7 = scmp.lt.s32.totalorder %s1623_s27, %s1623_s27 }
  0xc9   :  { %2287 = vmatprep.subr.bf16.mxu0 %v2286_v3  ;;  %v2294_v8 = vpack.c.bf16 %v282_v7, %v281_v6  ;;  %v284_v11 = vld [vmem:[#allocation7 + $0x38] sm:$0xff]  ;;  %1946 = vmatprep.mubr.f32.mxu0 %v245_v9  ;;  %v285_v13 = vld [vmem:[#allocation7 + $0x40] sm:$0xff]  ;;  %v286_v14 = vld [vmem:[#allocation7 + $0x48] sm:$0xff] }
  0xca   :  { %2289 = vmatpush3.bf16.msra.mxu0 %v2286_v3  ;;  %v2298_v12 = vpack.c.bf16 %v284_v11, %v283_v10  ;;  %v2302_v15 = vpack.c.bf16 %v286_v14, %v285_v13  ;;  %v287_v16 = vld [vmem:[#allocation7 + $0x50] sm:$0xff]  ;;  %v288_v17 = vld [vmem:[#allocation7 + $0x58] sm:$0xff]  ;;  %v289_v19 = vld [vmem:[#allocation7 + $0x60] sm:$0xff] }
  0xcb   :  { %2291 = vmatprep.subr.bf16.mxu0 %v2290_v5  ;;  %v2306_v18 = vpack.c.bf16 %v288_v17, %v287_v16  ;;  %v290_v20 = vld [vmem:[#allocation7 + $0x68] sm:$0xff]  ;;  %v291_v22 = vld [vmem:[#allocation7 + $0x70] sm:$0xff]  ;;  %v292_v23 = vld [vmem:[#allocation7 + $0x78] sm:$0xff] }
  0xcc   :  { %v2310_v21 = vpack.c.bf16 %v290_v20, %v289_v19  ;;  %v2314_v24 = vpack.c.bf16 %v292_v23, %v291_v22  ;;  %v229_v25 = vld [vmem:[#allocation5] sm:$0xff]  ;;  %v230_v26 = vld [vmem:[#allocation5 + $0x8] sm:$0xff]  ;;  %v231_v28 = vld [vmem:[#allocation5 + $0x10] sm:$0xff] }
  0xcd   :  { %v2318_v27 = vpack.c.bf16 %v230_v26, %v229_v25  ;;  %v232_v29 = vld [vmem:[#allocation5 + $0x18] sm:$0xff]  ;;  %v246_v30 = vld [vmem:[#allocation10 + $0x8] sm:$0xff]  ;;  %v839_v31 = vld [vmem:[#allocation14] sm:$0xff] }
  0xce   :  { %2293 = vmatpush3.bf16.msra.mxu0 %v2290_v5  ;;  %v840_v32 = vld [vmem:[#allocation14 + $0x8] sm:$0xff]  ;;  %v841_v33 = vld [vmem:[#allocation14 + $0x10] sm:$0xff]  ;;  %v2322_v35 = vpack.c.bf16 %v232_v29, %v231_v28  ;;  %v842_v37 = vld [vmem:[#allocation14 + $0x18] sm:$0xff] }
  0xcf   :  { %2295 = vmatprep.subr.bf16.mxu0 %v2294_v8  ;;  %v247_v34 = vld [vmem:[#allocation10 + $0x10] sm:$0xff]  ;;  %v2350_v36 = vpack.c.bf16 %v840_v32, %v839_v31  ;;  %v233_v38 = vld [vmem:[#allocation5 + $0x20] sm:$0xff]  ;;  %v234_v39 = vld [vmem:[#allocation5 + $0x28] sm:$0xff]  ;;  %v2354_v40 = vpack.c.bf16 %v842_v37, %v841_v33 }
  0xd0   :  { %v843_v41 = vld [vmem:[#allocation14 + $0x20] sm:$0xff]  ;;  %v844_v42 = vld [vmem:[#allocation14 + $0x28] sm:$0xff]  ;;  %v248_v43 = vld [vmem:[#allocation10 + $0x18] sm:$0xff]  ;;  %v2326_v45 = vpack.c.bf16 %v234_v39, %v233_v38 }
  0xd1   :  { %2351 = vmatprep.subr.bf16.mxu1 %v2350_v36  ;;  %v249_v44 = vld [vmem:[#allocation10 + $0x20] sm:$0xff]  ;;  %v235_v46 = vld [vmem:[#allocation5 + $0x30] sm:$0xff]  ;;  %v236_v47 = vld [vmem:[#allocation5 + $0x38] sm:$0xff]  ;;  %v2358_v48 = vpack.c.bf16 %v844_v42, %v843_v41 }
  0xd2   :  { %2297 = vmatpush3.bf16.msra.mxu0 %v2294_v8  ;;  %2353 = vmatpush3.bf16.msra.mxu1 %v2350_v36  ;;  %v845_v49 = vld [vmem:[#allocation14 + $0x30] sm:$0xff]  ;;  %v846_v50 = vld [vmem:[#allocation14 + $0x38] sm:$0xff]  ;;  %v250_v51 = vld [vmem:[#allocation10 + $0x28] sm:$0xff]  ;;  %v2330_v53 = vpack.c.bf16 %v236_v47, %v235_v46 }
  0xd3   :  { %2299 = vmatprep.subr.bf16.mxu0 %v2298_v12  ;;  %2355 = vmatprep.subr.bf16.mxu1 %v2354_v40  ;;  %v251_v52 = vld [vmem:[#allocation10 + $0x30] sm:$0xff]  ;;  %v237_v54 = vld [vmem:[#allocation5 + $0x40] sm:$0xff]  ;;  %v238_v55 = vld [vmem:[#allocation5 + $0x48] sm:$0xff]  ;;  %v2362_v56 = vpack.c.bf16 %v846_v50, %v845_v49 }
  0xd4   :  { %v252_v57 = vld [vmem:[#allocation10 + $0x38] sm:$0xff]  ;;  %v253_v58 = vld [vmem:[#allocation10 + $0x40] sm:$0xff]  ;;  %v2334_v59 = vpack.c.bf16 %v238_v55, %v237_v54  ;;  %v239_v60 = vld [vmem:[#allocation5 + $0x50] sm:$0xff] }
  0xd5   :  { %v240_v61 = vld [vmem:[#allocation5 + $0x58] sm:$0xff]  ;;  %v254_v62 = vld [vmem:[#allocation10 + $0x48] sm:$0xff]  ;;  %v255_v63 = vld [vmem:[#allocation10 + $0x50] sm:$0xff] }
  0xd6   :  { %2301 = vmatpush3.bf16.msra.mxu0 %v2298_v12  ;;  %2357 = vmatpush3.bf16.msra.mxu1 %v2354_v40  ;;  %v2338_v0 = vpack.c.bf16 %v240_v61, %v239_v60  ;;  %v241_v1 = vld [vmem:[#allocation5 + $0x60] sm:$0xff]  ;;  %v242_v2 = vld [vmem:[#allocation5 + $0x68] sm:$0xff]  ;;  %v256_v3 = vld [vmem:[#allocation10 + $0x58] sm:$0xff] }
  0xd7   :  { %2303 = vmatprep.subr.bf16.mxu0 %v2302_v15  ;;  %2359 = vmatprep.subr.bf16.mxu1 %v2358_v48  ;;  %v257_v4 = vld [vmem:[#allocation10 + $0x60] sm:$0xff]  ;;  %v2342_v5 = vpack.c.bf16 %v242_v2, %v241_v1  ;;  %v243_v6 = vld [vmem:[#allocation5 + $0x70] sm:$0xff]  ;;  %v244_v7 = vld [vmem:[#allocation5 + $0x78] sm:$0xff] }
  0xd8   :  { %v258_v8 = vld [vmem:[#allocation10 + $0x68] sm:$0xff]  ;;  %v259_v9 = vld [vmem:[#allocation10 + $0x70] sm:$0xff]  ;;  %v2346_v10 = vpack.c.bf16 %v244_v7, %v243_v6  ;;  %v260_v11 = vld [vmem:[#allocation10 + $0x78] sm:$0xff] }
  0xd9   :  { %v261_v12 = vld [vmem:[#allocation10 + $0x80] sm:$0xff]  ;;  %v262_v13 = vld [vmem:[#allocation10 + $0x88] sm:$0xff]  ;;  %v263_v14 = vld [vmem:[#allocation10 + $0x90] sm:$0xff] }
  0xda   :  { %2305 = vmatpush3.bf16.msra.mxu0 %v2302_v15  ;;  %2361 = vmatpush3.bf16.msra.mxu1 %v2358_v48  ;;  %v264_v15 = vld [vmem:[#allocation10 + $0x98] sm:$0xff]  ;;  %v265_v16 = vld [vmem:[#allocation10 + $0xa0] sm:$0xff]  ;;  %v266_v17 = vld [vmem:[#allocation10 + $0xa8] sm:$0xff] }
  0xdb   :  { %2307 = vmatprep.subr.bf16.mxu0 %v2306_v18  ;;  %2363 = vmatprep.subr.bf16.mxu1 %v2362_v56  ;;  %v268_v19 = vld [vmem:[#allocation10 + $0xb8] sm:$0xff]  ;;  %v269_v20 = vld [vmem:[#allocation10 + $0xc0] sm:$0xff]  ;;  %v271_v22 = vld [vmem:[#allocation10 + $0xd0] sm:$0xff] }
  0xdc   :  { %v272_v23 = vld [vmem:[#allocation10 + $0xd8] sm:$0xff]  ;;  %v274_v25 = vld [vmem:[#allocation10 + $0xe8] sm:$0xff]  ;;  %v275_v26 = vld [vmem:[#allocation10 + $0xf0] sm:$0xff] }
  0xdd   :  { %v197_v28 = vld [vmem:[#allocation8] sm:$0xff]  ;;  %v198_v29 = vld [vmem:[#allocation8 + $0x8] sm:$0xff]  ;;  %v200_v31 = vld [vmem:[#allocation8 + $0x18] sm:$0xff] }
  0xde   :  { %2309 = vmatpush3.bf16.msra.mxu0 %v2306_v18  ;;  %2365 = vmatpush3.bf16.msra.mxu1 %v2362_v56  ;;  %v267_v18 = vld [vmem:[#allocation10 + $0xb0] sm:$0xff]  ;;  %v201_v32 = vld [vmem:[#allocation8 + $0x20] sm:$0xff]  ;;  %v202_v33 = vld [vmem:[#allocation8 + $0x28] sm:$0xff] }
  0xdf   :  { %2311 = vmatprep.subr.bf16.mxu0 %v2310_v21  ;;  %v205_v36 = vld [vmem:[#allocation8 + $0x40] sm:$0xff]  ;;  %v206_v37 = vld [vmem:[#allocation8 + $0x48] sm:$0xff]  ;;  %v207_v38 = vld [vmem:[#allocation8 + $0x50] sm:$0xff] }
  0xe0   :  { %v208_v39 = vld [vmem:[#allocation8 + $0x58] sm:$0xff]  ;;  %v209_v40 = vld [vmem:[#allocation8 + $0x60] sm:$0xff]  ;;  %v210_v41 = vld [vmem:[#allocation8 + $0x68] sm:$0xff] }
  0xe1   :  { %v211_v42 = vld [vmem:[#allocation8 + $0x70] sm:$0xff]  ;;  %v216_v47 = vld [vmem:[#allocation8 + $0x98] sm:$0xff]  ;;  %v217_v48 = vld [vmem:[#allocation8 + $0xa0] sm:$0xff] }
  0xe2   :  { %2313 = vmatpush3.bf16.msra.mxu0 %v2310_v21  ;;  %v270_v21 = vld [vmem:[#allocation10 + $0xc8] sm:$0xff]  ;;  %v215_v46 = vld [vmem:[#allocation8 + $0x90] sm:$0xff]  ;;  %v224_v55 = vld [vmem:[#allocation8 + $0xd8] sm:$0xff] }
  0xe3   :  { %2315 = vmatprep.subr.bf16.mxu0 %v2314_v24  ;;  %v218_v49 = vld [vmem:[#allocation8 + $0xa8] sm:$0xff]  ;;  %v219_v50 = vld [vmem:[#allocation8 + $0xb0] sm:$0xff]  ;;  %v225_v56 = vld [vmem:[#allocation8 + $0xe0] sm:$0xff] }
  0xe4   :  { %v223_v54 = vld [vmem:[#allocation8 + $0xd0] sm:$0xff]  ;;  %v847_v60 = vld [vmem:[#allocation14 + $0x40] sm:$0xff]  ;;  %v848_v61 = vld [vmem:[#allocation14 + $0x48] sm:$0xff] }
  0xe5   :  { %v851_v2 = vld [vmem:[#allocation14 + $0x60] sm:$0xff]  ;;  %v854_v6 = vld [vmem:[#allocation14 + $0x78] sm:$0xff] }
  0xe6   :  { %2317 = vmatpush3.bf16.msra.mxu0 %v2314_v24  ;;  %v273_v24 = vld [vmem:[#allocation10 + $0xe0] sm:$0xff] }
  0xe7   :  { %2319 = vmatprep.subr.bf16.mxu0 %v2318_v27 }
  0xe9   :  { %1947 = vmatmul.mubr.f32.vlgmr.msra.gmra.mrb[0].mxu0 %v246_v30  ;;  %v199_v30 = vld [vmem:[#allocation8 + $0x10] sm:$0xff] }
  0xea   :  { %1949 = vmatprep.mubr.f32.mxu0 %v247_v34  ;;  %2321 = vmatpush3.bf16.msra.mxu0 %v2318_v27  ;;  %v276_v27 = vld [vmem:[#allocation10 + $0xf8] sm:$0xff]  ;;  %v203_v34 = vld [vmem:[#allocation8 + $0x30] sm:$0xff] }
  0xeb   :  { %2323 = vmatprep.subr.bf16.mxu0 %v2322_v35 }
  0xed   :  { %1950 = vmatmul.mubr.f32.gmra.mrb[2].mxu0 %v248_v43  ;;  %v212_v43 = vld [vmem:[#allocation8 + $0x78] sm:$0xff] }
  0xee   :  { %1952 = vmatprep.mubr.f32.mxu0 %v249_v44  ;;  %2325 = vmatpush3.bf16.msra.mxu0 %v2322_v35  ;;  %v204_v35 = vld [vmem:[#allocation8 + $0x38] sm:$0xff]  ;;  %v213_v44 = vld [vmem:[#allocation8 + $0x80] sm:$0xff] }
  0xef   :  { %2327 = vmatprep.subr.bf16.mxu0 %v2326_v45 }
  0xf1   :  { %1953 = vmatmul.mubr.f32.gmra.mrb[4].mxu0 %v250_v51  ;;  %v220_v51 = vld [vmem:[#allocation8 + $0xb8] sm:$0xff] }
  0xf2   :  { %1955 = vmatprep.mubr.f32.mxu0 %v251_v52  ;;  %2329 = vmatpush3.bf16.msra.mxu0 %v2326_v45  ;;  %v214_v45 = vld [vmem:[#allocation8 + $0x88] sm:$0xff]  ;;  %v221_v52 = vld [vmem:[#allocation8 + $0xc0] sm:$0xff] }
  0xf3   :  { %2331 = vmatprep.subr.bf16.mxu0 %v2330_v53 }
  0xf5   :  { %1956 = vmatmul.mubr.f32.gmra.mrb[6].mxu0 %v252_v57  ;;  %v226_v57 = vld [vmem:[#allocation8 + $0xe8] sm:$0xff] }
  0xf6   :  { %1958 = vmatprep.mubr.f32.mxu0 %v253_v58  ;;  %2333 = vmatpush3.bf16.msra.mxu0 %v2330_v53  ;;  %v222_v53 = vld [vmem:[#allocation8 + $0xc8] sm:$0xff]  ;;  %v227_v58 = vld [vmem:[#allocation8 + $0xf0] sm:$0xff] }
  0xf7   :  { %2335 = vmatprep.subr.bf16.mxu0 %v2334_v59 }
  0xf9   :  { %1959 = vmatmul.mubr.f32.gmra.mrb[8].mxu0 %v254_v62  ;;  %v2366_v62 = vpack.c.bf16 %v848_v61, %v847_v60 }
  0xfa   :  { %1961 = vmatprep.mubr.f32.mxu0 %v255_v63  ;;  %2337 = vmatpush3.bf16.msra.mxu0 %v2334_v59  ;;  %v228_v59 = vld [vmem:[#allocation8 + $0xf8] sm:$0xff]  ;;  %v849_v63 = vld [vmem:[#allocation14 + $0x50] sm:$0xff] }
  0xfb   :  { %2339 = vmatprep.subr.bf16.mxu0 %v2338_v0  ;;  %2367 = vmatprep.subr.bf16.mxu1 %v2366_v62 }
  0xfc   :  { %2369 = vmatpush3.bf16.msra.mxu1 %v2366_v62 }
  0xfd   :  { %1962 = vmatmul.mubr.f32.gmra.mrb[10].mxu0 %v256_v3  ;;  %v852_v3 = vld [vmem:[#allocation14 + $0x68] sm:$0xff] }
  0xfe   :  { %1964 = vmatprep.mubr.f32.mxu0 %v257_v4  ;;  %2341 = vmatpush3.bf16.msra.mxu0 %v2338_v0  ;;  %v850_v0 = vld [vmem:[#allocation14 + $0x58] sm:$0xff]  ;;  %v2374_v4 = vpack.c.bf16 %v852_v3, %v851_v2  ;;  %v759_v3 = vld [vmem:[#allocation11 + $0x80] sm:$0xff] }
  0xff   :  { %2343 = vmatprep.subr.bf16.mxu0 %v2342_v5  ;;  %v2370_v1 = vpack.c.bf16 %v850_v0, %v849_v63 }
 0x101   :  { %1965 = vmatmul.mubr.f32.gmra.mrb[12].mxu0 %v258_v8  ;;  %2371 = vmatprep.subr.bf16.mxu1 %v2370_v1  ;;  %v744_v8 = vld [vmem:[#allocation11 + $0x8] sm:$0xff] }
 0x102   :  { %1967 = vmatprep.mubr.f32.mxu0 %v259_v9  ;;  %2345 = vmatpush3.bf16.msra.mxu0 %v2342_v5  ;;  %v853_v5 = vld [vmem:[#allocation14 + $0x70] sm:$0xff]  ;;  %v743_v9 = vld [vmem:[#allocation11] sm:$0xff] }
 0x103   :  { %2347 = vmatprep.subr.bf16.mxu0 %v2346_v10  ;;  %2373 = vmatpush3.bf16.msra.mxu1 %v2370_v1  ;;  %v2378_v7 = vpack.c.bf16 %v854_v6, %v853_v5  ;;  %v760_v1 = vld [vmem:[#allocation11 + $0x88] sm:$0xff] }
 0x104   :  { %2375 = vmatprep.subr.bf16.mxu1 %v2374_v4 }
 0x105   :  { %1968 = vmatmul.mubr.f32.gmra.mrb[14].mxu0 %v260_v11 }
 0x106   :  { %1970 = vmatprep.mubr.f32.mxu0 %v261_v12  ;;  %2349 = vmatpush3.bf16.msra.mxu0 %v2346_v10 }
 0x107   :  { %2377 = vmatpush3.bf16.msra.mxu1 %v2374_v4 }
 0x108   :  { %2379 = vmatprep.subr.bf16.mxu1 %v2378_v7 }
 0x109   :  { %1971 = vmatmul.mubr.f32.gmra.mrb[16].mxu0 %v262_v13 }
 0x10a   :  { %1973 = vmatprep.mubr.f32.mxu0 %v263_v14  ;;  %v746_v14 = vld [vmem:[#allocation11 + $0x18] sm:$0xff] }
 0x10b   :  { %2381 = vmatpush3.bf16.msra.mxu1 %v2378_v7 }
 0x10d   :  { %1974 = vmatmul.mubr.f32.gmra.mrb[18].mxu0 %v264_v15  ;;  %v745_v15 = vld [vmem:[#allocation11 + $0x10] sm:$0xff] }
 0x10e   :  { %1976 = vmatprep.mubr.f32.mxu0 %v265_v16 }
 0x111   :  { %1977 = vmatmul.mubr.f32.gmra.mrb[20].mxu0 %v266_v17 }
 0x112   :  { %1979 = vmatprep.mubr.f32.mxu0 %v267_v18 }
 0x115   :  { %1980 = vmatmul.mubr.f32.gmra.mrb[22].mxu0 %v268_v19 }
 0x116   :  { %1982 = vmatprep.mubr.f32.mxu0 %v269_v20  ;;  %v748_v20 = vld [vmem:[#allocation11 + $0x28] sm:$0xff] }
 0x119   :  { %1983 = vmatmul.mubr.f32.gmra.mrb[24].mxu0 %v270_v21  ;;  %v747_v21 = vld [vmem:[#allocation11 + $0x20] sm:$0xff] }
 0x11a   :  { %1985 = vmatprep.mubr.f32.mxu0 %v271_v22 }
 0x11d   :  { %1986 = vmatmul.mubr.f32.gmra.mrb[26].mxu0 %v272_v23 }
 0x11e   :  { %1988 = vmatprep.mubr.f32.mxu0 %v273_v24 }
 0x121   :  { %1989 = vmatmul.mubr.f32.gmra.mrb[28].mxu0 %v274_v25 }
 0x122   :  { %1991 = vmatprep.mubr.f32.mxu0 %v275_v26  ;;  %v750_v26 = vld [vmem:[#allocation11 + $0x38] sm:$0xff] }
 0x125   :  { %1992 = vmatmul.mubr.f32.gmra.mrb[30].mxu0 %v276_v27  ;;  %v749_v27 = vld [vmem:[#allocation11 + $0x30] sm:$0xff] }
 0x126   :  { %2026 = vmatprep.mubr.f32.mxu0 %v197_v28 }
 0x129   :  { %2027 = vmatmul.mubr.f32.vlgmr.msra.gmra.mrb[0].mxu0 %v198_v29 }
 0x12a   :  { %2029 = vmatprep.mubr.f32.mxu0 %v199_v30 }
 0x12d   :  { %2030 = vmatmul.mubr.f32.gmra.mrb[2].mxu0 %v200_v31 }
 0x12e   :  { %2032 = vmatprep.mubr.f32.mxu0 %v201_v32 }
 0x131   :  { %2033 = vmatmul.mubr.f32.gmra.mrb[4].mxu0 %v202_v33  ;;  %v752_v33 = vld [vmem:[#allocation11 + $0x48] sm:$0xff] }
 0x132   :  { %2035 = vmatprep.mubr.f32.mxu0 %v203_v34 }
 0x135   :  { %2036 = vmatmul.mubr.f32.gmra.mrb[6].mxu0 %v204_v35  ;;  %v751_v35 = vld [vmem:[#allocation11 + $0x40] sm:$0xff] }
 0x136   :  { %2038 = vmatprep.mubr.f32.mxu0 %v205_v36 }
 0x139   :  { %2039 = vmatmul.mubr.f32.gmra.mrb[8].mxu0 %v206_v37 }
 0x13a   :  { %2041 = vmatprep.mubr.f32.mxu0 %v207_v38 }
 0x13d   :  { %2042 = vmatmul.mubr.f32.gmra.mrb[10].mxu0 %v208_v39 }
 0x13e   :  { %2044 = vmatprep.mubr.f32.mxu0 %v209_v40 }
 0x141   :  { %2045 = vmatmul.mubr.f32.gmra.mrb[12].mxu0 %v210_v41  ;;  %v754_v41 = vld [vmem:[#allocation11 + $0x58] sm:$0xff] }
 0x142   :  { %2047 = vmatprep.mubr.f32.mxu0 %v211_v42 }
 0x145   :  { %2048 = vmatmul.mubr.f32.gmra.mrb[14].mxu0 %v212_v43  ;;  %v753_v43 = vld [vmem:[#allocation11 + $0x50] sm:$0xff] }
 0x146   :  { %2050 = vmatprep.mubr.f32.mxu0 %v213_v44 }
 0x149   :  { %2051 = vmatmul.mubr.f32.gmra.mrb[16].mxu0 %v214_v45 }
 0x14a   :  { %2053 = vmatprep.mubr.f32.mxu0 %v215_v46 }
 0x14d   :  { %2054 = vmatmul.mubr.f32.gmra.mrb[18].mxu0 %v216_v47 }
 0x14e   :  { %2056 = vmatprep.mubr.f32.mxu0 %v217_v48 }
 0x151   :  { %2057 = vmatmul.mubr.f32.gmra.mrb[20].mxu0 %v218_v49  ;;  %v756_v49 = vld [vmem:[#allocation11 + $0x68] sm:$0xff] }
 0x152   :  { %2059 = vmatprep.mubr.f32.mxu0 %v219_v50 }
 0x155   :  { %2060 = vmatmul.mubr.f32.gmra.mrb[22].mxu0 %v220_v51  ;;  %v755_v51 = vld [vmem:[#allocation11 + $0x60] sm:$0xff] }
 0x156   :  { %2062 = vmatprep.mubr.f32.mxu0 %v221_v52 }
 0x159   :  { %2063 = vmatmul.mubr.f32.gmra.mrb[24].mxu0 %v222_v53 }
 0x15a   :  { %2065 = vmatprep.mubr.f32.mxu0 %v223_v54 }
 0x15d   :  { %2066 = vmatmul.mubr.f32.gmra.mrb[26].mxu0 %v224_v55 }
 0x15e   :  { %2068 = vmatprep.mubr.f32.mxu0 %v225_v56 }
 0x161   :  { %2069 = vmatmul.mubr.f32.gmra.mrb[28].mxu0 %v226_v57  ;;  %v758_v57 = vld [vmem:[#allocation11 + $0x78] sm:$0xff] }
 0x162   :  { %2071 = vmatprep.mubr.f32.mxu0 %v227_v58 }
 0x165   :  { %2072 = vmatmul.mubr.f32.gmra.mrb[30].mxu0 %v228_v59  ;;  %v757_v59 = vld [vmem:[#allocation11 + $0x70] sm:$0xff] }
 0x1fc   :  { %v2028_v10 = vpop.f32.mrb[0].mxu0 }
 0x1fd   :  { %v776_v11 = vadd.f32 %v2028_v10, %v744_v8  ;;  %v584_v12 = vpop.f32.mrb[1].mxu0 }
 0x1fe   :  { %v775_v13 = vadd.f32 %v743_v9, %v584_v12  ;;  %v762_v9 = vld [vmem:[#allocation11 + $0x98] sm:$0xff] }
 0x200   :  { %2566 = vtanh.f32 %v775_v13  ;;  %v2031_v16 = vpop.f32.mrb[2].mxu0 }
 0x201   :  { %2568 = vtanh.f32 %v776_v11  ;;  %v778_v17 = vadd.f32 %v2031_v16, %v746_v14  ;;  %v594_v18 = vpop.f32.mrb[3].mxu0  ;;  %v761_v11 = vld [vmem:[#allocation11 + $0x90] sm:$0xff] }
 0x202   :  { %v777_v19 = vadd.f32 %v745_v15, %v594_v18 }
 0x204   :  { %2570 = vtanh.f32 %v777_v19  ;;  %v2034_v22 = vpop.f32.mrb[4].mxu0  ;;  %v763_v19 = vld [vmem:[#allocation11 + $0xa0] sm:$0xff] }
 0x205   :  { %2572 = vtanh.f32 %v778_v17  ;;  %v780_v23 = vadd.f32 %v2034_v22, %v748_v20  ;;  %v604_v24 = vpop.f32.mrb[5].mxu0  ;;  %v764_v17 = vld [vmem:[#allocation11 + $0xa8] sm:$0xff] }
 0x206   :  { %v779_v25 = vadd.f32 %v747_v21, %v604_v24 }
 0x208   :  { %2574 = vtanh.f32 %v779_v25  ;;  %v2037_v28 = vpop.f32.mrb[6].mxu0  ;;  %v766_v25 = vld [vmem:[#allocation11 + $0xb8] sm:$0xff] }
 0x209   :  { %2576 = vtanh.f32 %v780_v23  ;;  %v782_v29 = vadd.f32 %v2037_v28, %v750_v26  ;;  %v614_v30 = vpop.f32.mrb[7].mxu0 }
 0x20a   :  { %v2567_v31 = vpop.eup %2566  ;;  %v781_v32 = vadd.f32 %v749_v27, %v614_v30  ;;  %v765_v27 = vld [vmem:[#allocation11 + $0xb0] sm:$0xff] }
 0x20b   :  { %v2569_v34 = vpop.eup %2568  ;;  %2106 = vmatprep.mubr.f32.mxu1 %v2567_v31 }
 0x20c   :  { %2578 = vtanh.f32 %v781_v32  ;;  %v2040_v36 = vpop.f32.mrb[8].mxu0  ;;  %2107 = vmatmul.mubr.f32.vlgmr.msra.gmra.mrb[0].mxu1 %v2569_v34 }
 0x20d   :  { %2580 = vtanh.f32 %v782_v29  ;;  %v784_v37 = vadd.f32 %v2040_v36, %v752_v33  ;;  %v624_v38 = vpop.f32.mrb[9].mxu0  ;;  %v768_v33 = vld [vmem:[#allocation11 + $0xc8] sm:$0xff] }
 0x20e   :  { %v2571_v39 = vpop.eup %2570  ;;  %v783_v40 = vadd.f32 %v751_v35, %v624_v38  ;;  %v767_v35 = vld [vmem:[#allocation11 + $0xc0] sm:$0xff] }
 0x20f   :  { %v2573_v42 = vpop.eup %2572  ;;  %2109 = vmatprep.mubr.f32.mxu1 %v2571_v39 }
 0x210   :  { %2582 = vtanh.f32 %v783_v40  ;;  %v2043_v44 = vpop.f32.mrb[10].mxu0  ;;  %2110 = vmatmul.mubr.f32.gmra.mrb[2].mxu1 %v2573_v42 }
 0x211   :  { %2584 = vtanh.f32 %v784_v37  ;;  %v786_v45 = vadd.f32 %v2043_v44, %v754_v41  ;;  %v634_v46 = vpop.f32.mrb[11].mxu0  ;;  %v770_v41 = vld [vmem:[#allocation11 + $0xd8] sm:$0xff] }
 0x212   :  { %v2575_v47 = vpop.eup %2574  ;;  %v785_v48 = vadd.f32 %v753_v43, %v634_v46  ;;  %v769_v43 = vld [vmem:[#allocation11 + $0xd0] sm:$0xff] }
 0x213   :  { %v2577_v50 = vpop.eup %2576  ;;  %2112 = vmatprep.mubr.f32.mxu1 %v2575_v47 }
 0x214   :  { %2586 = vtanh.f32 %v785_v48  ;;  %v2046_v52 = vpop.f32.mrb[12].mxu0  ;;  %2113 = vmatmul.mubr.f32.gmra.mrb[4].mxu1 %v2577_v50 }
 0x215   :  { %2588 = vtanh.f32 %v786_v45  ;;  %v788_v53 = vadd.f32 %v2046_v52, %v756_v49  ;;  %v644_v54 = vpop.f32.mrb[13].mxu0  ;;  %v772_v49 = vld [vmem:[#allocation11 + $0xe8] sm:$0xff] }
 0x216   :  { %v2579_v55 = vpop.eup %2578  ;;  %v787_v56 = vadd.f32 %v755_v51, %v644_v54  ;;  %v771_v51 = vld [vmem:[#allocation11 + $0xe0] sm:$0xff] }
 0x217   :  { %v2581_v58 = vpop.eup %2580  ;;  %2115 = vmatprep.mubr.f32.mxu1 %v2579_v55 }
 0x218   :  { %2590 = vtanh.f32 %v787_v56  ;;  %v2049_v60 = vpop.f32.mrb[14].mxu0  ;;  %2116 = vmatmul.mubr.f32.gmra.mrb[6].mxu1 %v2581_v58 }
 0x219   :  { %2592 = vtanh.f32 %v788_v53  ;;  %v790_v61 = vadd.f32 %v2049_v60, %v758_v57  ;;  %v654_v62 = vpop.f32.mrb[15].mxu0  ;;  %v774_v57 = vld [vmem:[#allocation11 + $0xf8] sm:$0xff] }
 0x21a   :  { %v2583_v63 = vpop.eup %2582  ;;  %v789_v0 = vadd.f32 %v757_v59, %v654_v62  ;;  %v773_v59 = vld [vmem:[#allocation11 + $0xf0] sm:$0xff] }
 0x21b   :  { %v2585_v2 = vpop.eup %2584  ;;  %2118 = vmatprep.mubr.f32.mxu1 %v2583_v63 }
 0x21c   :  { %2594 = vtanh.f32 %v789_v0  ;;  %v2052_v4 = vpop.f32.mrb[16].mxu0  ;;  %2119 = vmatmul.mubr.f32.gmra.mrb[8].mxu1 %v2585_v2 }
 0x21d   :  { %2596 = vtanh.f32 %v790_v61  ;;  %v792_v5 = vadd.f32 %v2052_v4, %v760_v1  ;;  %v664_v6 = vpop.f32.mrb[17].mxu0 }
 0x21e   :  { %v2587_v7 = vpop.eup %2586  ;;  %v791_v8 = vadd.f32 %v759_v3, %v664_v6 }
 0x21f   :  { %v2589_v10 = vpop.eup %2588  ;;  %2121 = vmatprep.mubr.f32.mxu1 %v2587_v7 }
 0x220   :  { %2598 = vtanh.f32 %v791_v8  ;;  %v2055_v12 = vpop.f32.mrb[18].mxu0  ;;  %2122 = vmatmul.mubr.f32.gmra.mrb[10].mxu1 %v2589_v10  ;;  %v1088_v8 = vld [vmem:[#allocation13 + $0x8] sm:$0xff] }
 0x221   :  { %2600 = vtanh.f32 %v792_v5  ;;  %v794_v13 = vadd.f32 %v2055_v12, %v762_v9  ;;  %v674_v14 = vpop.f32.mrb[19].mxu0  ;;  %v3211_v9 = vld [vmem:[%s3280_s8] ss:$0 sm:$0xff] }
 0x222   :  { %v2591_v15 = vpop.eup %2590  ;;  %v793_v16 = vadd.f32 %v761_v11, %v674_v14 }
 0x223   :  { %v2593_v18 = vpop.eup %2592  ;;  %2124 = vmatprep.mubr.f32.mxu1 %v2591_v15 }
 0x224   :  { %2602 = vtanh.f32 %v793_v16  ;;  %v2058_v20 = vpop.f32.mrb[20].mxu0  ;;  %2125 = vmatmul.mubr.f32.gmra.mrb[12].mxu1 %v2593_v18 }
 0x225   :  { %2604 = vtanh.f32 %v794_v13  ;;  %v796_v21 = vadd.f32 %v2058_v20, %v764_v17  ;;  %v684_v22 = vpop.f32.mrb[21].mxu0 }
 0x226   :  { %v2595_v23 = vpop.eup %2594  ;;  %v795_v24 = vadd.f32 %v763_v19, %v684_v22 }
 0x227   :  { %v2597_v26 = vpop.eup %2596  ;;  %2127 = vmatprep.mubr.f32.mxu1 %v2595_v23 }
 0x228   :  { %2606 = vtanh.f32 %v795_v24  ;;  %v2061_v28 = vpop.f32.mrb[22].mxu0  ;;  %2128 = vmatmul.mubr.f32.gmra.mrb[14].mxu1 %v2597_v26 }
 0x229   :  { %2608 = vtanh.f32 %v796_v21  ;;  %v798_v29 = vadd.f32 %v2061_v28, %v766_v25  ;;  %v694_v30 = vpop.f32.mrb[23].mxu0 }
 0x22a   :  { %v2599_v31 = vpop.eup %2598  ;;  %v797_v32 = vadd.f32 %v765_v27, %v694_v30 }
 0x22b   :  { %v2601_v34 = vpop.eup %2600  ;;  %2130 = vmatprep.mubr.f32.mxu1 %v2599_v31 }
 0x22c   :  { %2610 = vtanh.f32 %v797_v32  ;;  %v2064_v36 = vpop.f32.mrb[24].mxu0  ;;  %2131 = vmatmul.mubr.f32.gmra.mrb[16].mxu1 %v2601_v34 }
 0x22d   :  { %2612 = vtanh.f32 %v798_v29  ;;  %v800_v37 = vadd.f32 %v2064_v36, %v768_v33  ;;  %v704_v38 = vpop.f32.mrb[25].mxu0 }
 0x22e   :  { %v2603_v39 = vpop.eup %2602  ;;  %v799_v40 = vadd.f32 %v767_v35, %v704_v38 }
 0x22f   :  { %v2605_v42 = vpop.eup %2604  ;;  %2133 = vmatprep.mubr.f32.mxu1 %v2603_v39 }
 0x230   :  { %2614 = vtanh.f32 %v799_v40  ;;  %v2067_v44 = vpop.f32.mrb[26].mxu0  ;;  %2134 = vmatmul.mubr.f32.gmra.mrb[18].mxu1 %v2605_v42 }
 0x231   :  { %2616 = vtanh.f32 %v800_v37  ;;  %v802_v45 = vadd.f32 %v2067_v44, %v770_v41  ;;  %v714_v46 = vpop.f32.mrb[27].mxu0 }
 0x232   :  { %v2607_v47 = vpop.eup %2606  ;;  %v801_v48 = vadd.f32 %v769_v43, %v714_v46 }
 0x233   :  { %v2609_v50 = vpop.eup %2608  ;;  %2136 = vmatprep.mubr.f32.mxu1 %v2607_v47 }
 0x234   :  { %2618 = vtanh.f32 %v801_v48  ;;  %v2070_v52 = vpop.f32.mrb[28].mxu0  ;;  %2137 = vmatmul.mubr.f32.gmra.mrb[20].mxu1 %v2609_v50 }
 0x235   :  { %2620 = vtanh.f32 %v802_v45  ;;  %v804_v53 = vadd.f32 %v2070_v52, %v772_v49  ;;  %v724_v54 = vpop.f32.mrb[29].mxu0 }
 0x236   :  { %v2611_v55 = vpop.eup %2610  ;;  %v803_v56 = vadd.f32 %v771_v51, %v724_v54 }
 0x237   :  { %v2613_v58 = vpop.eup %2612  ;;  %2139 = vmatprep.mubr.f32.mxu1 %v2611_v55 }
 0x238   :  { %2622 = vtanh.f32 %v803_v56  ;;  %v2073_v60 = vpop.f32.mrb[30].mxu0  ;;  %2140 = vmatmul.mubr.f32.gmra.mrb[22].mxu1 %v2613_v58 }
 0x239   :  { %2624 = vtanh.f32 %v804_v53  ;;  %v806_v61 = vadd.f32 %v2073_v60, %v774_v57  ;;  %v734_v62 = vpop.f32.mrb[31].mxu0 }
 0x23a   :  { %v2615_v63 = vpop.eup %2614  ;;  %v805_v0 = vadd.f32 %v773_v59, %v734_v62 }
 0x23b   :  { %v2617_v1 = vpop.eup %2616  ;;  %2142 = vmatprep.mubr.f32.mxu1 %v2615_v63 }
 0x23c   :  { %2626 = vtanh.f32 %v805_v0  ;;  %2143 = vmatmul.mubr.f32.gmra.mrb[24].mxu1 %v2617_v1 }
 0x23d   :  { %2628 = vtanh.f32 %v806_v61 }
 0x23e   :  { %v2619_v2 = vpop.eup %2618 }
 0x23f   :  { %v2621_v3 = vpop.eup %2620  ;;  %2145 = vmatprep.mubr.f32.mxu1 %v2619_v2 }
 0x240   :  { %2146 = vmatmul.mubr.f32.gmra.mrb[26].mxu1 %v2621_v3 }
 0x242   :  { %v2623_v4 = vpop.eup %2622 }
 0x243   :  { %v2625_v5 = vpop.eup %2624  ;;  %2148 = vmatprep.mubr.f32.mxu1 %v2623_v4 }
 0x244   :  { %2149 = vmatmul.mubr.f32.gmra.mrb[28].mxu1 %v2625_v5 }
 0x246   :  { %v2627_v6 = vpop.eup %2626 }
 0x247   :  { %v2629_v7 = vpop.eup %2628  ;;  %2151 = vmatprep.mubr.f32.mxu1 %v2627_v6 }
 0x248   :  { %2152 = vmatmul.mubr.f32.gmra.mrb[30].mxu1 %v2629_v7 }
 0x249   :  { %1167 = vmatprep.mubr.f32.mxu1 %v1088_v8 }
 0x2df   :  { %v2108_v10 = vpop.f32.mrb[0].mxu1 }
 0x2e0   :  { %v934_v11 = vadd.f32 %v2108_v10, %v3211_v9  ;;  %v928_v12 = vpop.f32.mrb[1].mxu1 }
 0x2e1   :  { %v929_v13 = vadd.f32 %v3211_v9, %v928_v12 }
 0x2e3   :  { %v2384_v14 = vpack.c.bf16 %v934_v11, %v929_v13  ;;  %v2111_v15 = vpop.f32.mrb[2].mxu1 }
 0x2e4   :  { %v944_v16 = vadd.f32 %v2111_v15, %v3211_v9  ;;  %v938_v17 = vpop.f32.mrb[3].mxu1 }
 0x2e5   :  { %v939_v18 = vadd.f32 %v3211_v9, %v938_v17 }
 0x2e7   :  { %v2388_v19 = vpack.c.bf16 %v944_v16, %v939_v18  ;;  %v2114_v20 = vpop.f32.mrb[4].mxu1 }
 0x2e8   :  { %v954_v21 = vadd.f32 %v2114_v20, %v3211_v9  ;;  %v948_v22 = vpop.f32.mrb[5].mxu1 }
 0x2e9   :  { %v949_v23 = vadd.f32 %v3211_v9, %v948_v22 }
 0x2eb   :  { %v2392_v24 = vpack.c.bf16 %v954_v21, %v949_v23  ;;  %v2117_v25 = vpop.f32.mrb[6].mxu1 }
 0x2ec   :  { %v964_v26 = vadd.f32 %v2117_v25, %v3211_v9  ;;  %v958_v27 = vpop.f32.mrb[7].mxu1  ;;  %v1232_v25 = vld [vmem:[#allocation17] sm:$0xff] }
 0x2ed   :  { %v959_v28 = vadd.f32 %v3211_v9, %v958_v27 }
 0x2ef   :  { %v2396_v29 = vpack.c.bf16 %v964_v26, %v959_v28  ;;  %v2120_v30 = vpop.f32.mrb[8].mxu1  ;;  %v1233_v26 = vld [vmem:[#allocation17 + $0x8] sm:$0xff] }
 0x2f0   :  { %v974_v31 = vadd.f32 %v2120_v30, %v3211_v9  ;;  %v968_v32 = vpop.f32.mrb[9].mxu1  ;;  %v1234_v30 = vld [vmem:[#allocation17 + $0x10] sm:$0xff] }
 0x2f1   :  { %v969_v33 = vadd.f32 %v3211_v9, %v968_v32  ;;  %v1087_v32 = vld [vmem:[#allocation13] sm:$0xff] }
 0x2f3   :  { %v2400_v34 = vpack.c.bf16 %v974_v31, %v969_v33  ;;  %v2123_v35 = vpop.f32.mrb[10].mxu1  ;;  %v1235_v31 = vld [vmem:[#allocation17 + $0x18] sm:$0xff] }
 0x2f4   :  { %v984_v36 = vadd.f32 %v2123_v35, %v3211_v9  ;;  %v978_v37 = vpop.f32.mrb[11].mxu1  ;;  %v1090_v33 = vld [vmem:[#allocation13 + $0x18] sm:$0xff]  ;;  %v1236_v35 = vld [vmem:[#allocation17 + $0x20] sm:$0xff] }
 0x2f5   :  { %v979_v38 = vadd.f32 %v3211_v9, %v978_v37  ;;  %v1089_v37 = vld [vmem:[#allocation13 + $0x10] sm:$0xff] }
 0x2f7   :  { %v2404_v39 = vpack.c.bf16 %v984_v36, %v979_v38  ;;  %v2126_v40 = vpop.f32.mrb[12].mxu1  ;;  %v1237_v36 = vld [vmem:[#allocation17 + $0x28] sm:$0xff] }
 0x2f8   :  { %v3226_v41 = vadd.f32 %v2126_v40, %v3211_v9  ;;  %v988_v42 = vpop.f32.mrb[13].mxu1  ;;  %v1092_v38 = vld [vmem:[#allocation13 + $0x28] sm:$0xff]  ;;  %v1239_v40 = vld [vmem:[#allocation17 + $0x38] sm:$0xff] }
 0x2f9   :  { %v989_v43 = vadd.f32 %v3211_v9, %v988_v42  ;;  %v1094_v42 = vld [vmem:[#allocation13 + $0x38] sm:$0xff] }
 0x2fb   :  { %v2408_v44 = vpack.c.bf16 %v3226_v41, %v989_v43  ;;  %v2129_v45 = vpop.f32.mrb[14].mxu1  ;;  %v1091_v41 = vld [vmem:[#allocation13 + $0x20] sm:$0xff] }
 0x2fc   :  { %v3231_v46 = vadd.f32 %v2129_v45, %v3211_v9  ;;  %v998_v47 = vpop.f32.mrb[15].mxu1  ;;  %v1241_v45 = vld [vmem:[#allocation17 + $0x48] sm:$0xff] }
 0x2fd   :  { %v999_v48 = vadd.f32 %v3211_v9, %v998_v47  ;;  %v1096_v47 = vld [vmem:[#allocation13 + $0x48] sm:$0xff] }
 0x2ff   :  { %v2412_v49 = vpack.c.bf16 %v3231_v46, %v999_v48  ;;  %v2132_v50 = vpop.f32.mrb[16].mxu1  ;;  %v1093_v46 = vld [vmem:[#allocation13 + $0x30] sm:$0xff] }
 0x300   :  { %v1014_v51 = vadd.f32 %v2132_v50, %v3211_v9  ;;  %v1008_v52 = vpop.f32.mrb[17].mxu1  ;;  %v1243_v50 = vld [vmem:[#allocation17 + $0x58] sm:$0xff] }
 0x301   :  { %v1009_v53 = vadd.f32 %v3211_v9, %v1008_v52  ;;  %v1098_v52 = vld [vmem:[#allocation13 + $0x58] sm:$0xff] }
 0x303   :  { %v2382_v54 = vpack.c.bf16 %v1014_v51, %v1009_v53  ;;  %v2135_v55 = vpop.f32.mrb[18].mxu1  ;;  %v1095_v51 = vld [vmem:[#allocation13 + $0x40] sm:$0xff] }
 0x304   :  { %v1024_v56 = vadd.f32 %v2135_v55, %v3211_v9  ;;  %v1018_v57 = vpop.f32.mrb[19].mxu1  ;;  %v1245_v55 = vld [vmem:[#allocation17 + $0x68] sm:$0xff] }
 0x305   :  { %v1019_v58 = vadd.f32 %v3211_v9, %v1018_v57  ;;  %2383 = vmatprep.subr.bf16.mxu1 %v2382_v54  ;;  %v1244_v54 = vld [vmem:[#allocation17 + $0x60] sm:$0xff]  ;;  %v1100_v57 = vld [vmem:[#allocation13 + $0x68] sm:$0xff] }
 0x306   :  { %2385 = vmatpush3.bf16.msra.mxu1 %v2384_v14 }
 0x307   :  { %v2386_v59 = vpack.c.bf16 %v1024_v56, %v1019_v58  ;;  %v2138_v60 = vpop.f32.mrb[20].mxu1  ;;  %v1097_v56 = vld [vmem:[#allocation13 + $0x50] sm:$0xff]  ;;  %v2438_v58 = vpack.c.bf16 %v1245_v55, %v1244_v54 }
 0x308   :  { %v1034_v61 = vadd.f32 %v2138_v60, %v3211_v9  ;;  %v1028_v62 = vpop.f32.mrb[21].mxu1  ;;  %v1102_v60 = vld [vmem:[#allocation13 + $0x78] sm:$0xff]  ;;  %v1230_v55 = vld [vmem:[#allocation16 + $0x70] sm:$0xff] }
 0x309   :  { %v1029_v63 = vadd.f32 %v3211_v9, %v1028_v62  ;;  %2387 = vmatprep.subr.bf16.mxu1 %v2386_v59  ;;  %v1099_v59 = vld [vmem:[#allocation13 + $0x60] sm:$0xff]  ;;  %v1246_v62 = vld [vmem:[#allocation17 + $0x70] sm:$0xff] }
 0x30a   :  { %2389 = vmatpush3.bf16.msra.mxu1 %v2388_v19 }
 0x30b   :  { %v2390_v0 = vpack.c.bf16 %v1034_v61, %v1029_v63  ;;  %v2141_v1 = vpop.f32.mrb[22].mxu1  ;;  %v1101_v61 = vld [vmem:[#allocation13 + $0x70] sm:$0xff]  ;;  %v1247_v63 = vld [vmem:[#allocation17 + $0x78] sm:$0xff] }
 0x30c   :  { %v1044_v2 = vadd.f32 %v2141_v1, %v3211_v9  ;;  %v1038_v3 = vpop.f32.mrb[23].mxu1  ;;  %v1216_v1 = vld [vmem:[#allocation16] sm:$0xff] }
 0x30d   :  { %v1039_v4 = vadd.f32 %v3211_v9, %v1038_v3  ;;  %2391 = vmatprep.subr.bf16.mxu1 %v2390_v0  ;;  %v2442_v0 = vpack.c.bf16 %v1247_v63, %v1246_v62  ;;  %v1209_v62 = vld [vmem:[#allocation2 + $0x8] sm:$0xff]  ;;  %v1210_v63 = vld [vmem:[#allocation2 + $0x10] sm:$0xff] }
 0x30e   :  { %2393 = vmatpush3.bf16.msra.mxu1 %v2392_v24 }
 0x30f   :  { %v2394_v5 = vpack.c.bf16 %v1044_v2, %v1039_v4  ;;  %v2144_v6 = vpop.f32.mrb[24].mxu1  ;;  %v1217_v2 = vld [vmem:[#allocation16 + $0x8] sm:$0xff]  ;;  %v1481_v4 = vld [vmem:[#allocation19] sm:$0xff] }
 0x310   :  { %v1054_v7 = vadd.f32 %v2144_v6, %v3211_v9  ;;  %v1048_v8 = vpop.f32.mrb[25].mxu1  ;;  %v2446_v3 = vpack.c.bf16 %v1217_v2, %v1216_v1  ;;  %v1483_v6 = vld [vmem:[#allocation19 + $0x10] sm:$0xff]  ;;  %v1212_v1 = vld [vmem:[#allocation2 + $0x20] sm:$0xff]  ;;  %v1213_v2 = vld [vmem:[#allocation2 + $0x28] sm:$0xff] }
 0x311   :  { %v1049_v10 = vadd.f32 %v3211_v9, %v1048_v8  ;;  %2395 = vmatprep.subr.bf16.mxu1 %v2394_v5  ;;  %v1482_v5 = vld [vmem:[#allocation19 + $0x8] sm:$0xff]  ;;  %v1484_v8 = vld [vmem:[#allocation19 + $0x18] sm:$0xff] }
 0x312   :  { %2397 = vmatpush3.bf16.msra.mxu1 %v2396_v29  ;;  %v2414_v29 = vpack.c.bf16 %v1233_v26, %v1232_v25  ;;  %v1220_v26 = vld [vmem:[#allocation16 + $0x20] sm:$0xff] }
 0x313   :  { %v2398_v11 = vpack.c.bf16 %v1054_v7, %v1049_v10  ;;  %v2147_v12 = vpop.f32.mrb[26].mxu1  ;;  %v2478_v7 = vpack.c.bf16 %v1482_v5, %v1481_v4  ;;  %v2482_v10 = vpack.c.bf16 %v1484_v8, %v1483_v6  ;;  %v1215_v4 = vld [vmem:[#allocation2 + $0x38] sm:$0xff]  ;;  %v1489_v5 = vld [vmem:[#allocation19 + $0x40] sm:$0xff]  ;;  %v1490_v6 = vld [vmem:[#allocation19 + $0x48] sm:$0xff] }
 0x314   :  { %v1064_v13 = vadd.f32 %v2147_v12, %v3211_v9  ;;  %v1058_v14 = vpop.f32.mrb[27].mxu1  ;;  %v1486_v12 = vld [vmem:[#allocation19 + $0x28] sm:$0xff]  ;;  %v1491_v8 = vld [vmem:[#allocation19 + $0x50] sm:$0xff] }
 0x315   :  { %v1059_v15 = vadd.f32 %v3211_v9, %v1058_v14  ;;  %2399 = vmatprep.subr.bf16.mxu1 %v2398_v11  ;;  %v1485_v11 = vld [vmem:[#allocation19 + $0x20] sm:$0xff]  ;;  %2479 = vmatprep.subr.bf16.mxu0 %v2478_v7  ;;  %v1487_v14 = vld [vmem:[#allocation19 + $0x30] sm:$0xff] }
 0x316   :  { %2401 = vmatpush3.bf16.msra.mxu1 %v2400_v34  ;;  %v2418_v34 = vpack.c.bf16 %v1235_v31, %v1234_v30  ;;  %2481 = vmatpush3.bf16.msra.mxu0 %v2478_v7  ;;  %v2494_v7 = vpack.c.bf16 %v1490_v6, %v1489_v5 }
 0x317   :  { %v2402_v16 = vpack.c.bf16 %v1064_v13, %v1059_v15  ;;  %v2150_v17 = vpop.f32.mrb[28].mxu1  ;;  %2483 = vmatprep.subr.bf16.mxu0 %v2482_v10  ;;  %v2486_v13 = vpack.c.bf16 %v1486_v12, %v1485_v11  ;;  %v1488_v15 = vld [vmem:[#allocation19 + $0x38] sm:$0xff]  ;;  %v1493_v12 = vld [vmem:[#allocation19 + $0x60] sm:$0xff] }
 0x318   :  { %v1074_v18 = vadd.f32 %v2150_v17, %v3211_v9  ;;  %v1068_v19 = vpop.f32.mrb[29].mxu1 }
 0x319   :  { %v1069_v20 = vadd.f32 %v3211_v9, %v1068_v19  ;;  %2403 = vmatprep.subr.bf16.mxu1 %v2402_v16  ;;  %v2490_v16 = vpack.c.bf16 %v1488_v15, %v1487_v14  ;;  %v1495_v15 = vld [vmem:[#allocation19 + $0x70] sm:$0xff] }
 0x31a   :  { %2405 = vmatpush3.bf16.msra.mxu1 %v2404_v39  ;;  %v1238_v39 = vld [vmem:[#allocation17 + $0x30] sm:$0xff]  ;;  %2485 = vmatpush3.bf16.msra.mxu0 %v2482_v10  ;;  %v1492_v10 = vld [vmem:[#allocation19 + $0x58] sm:$0xff] }
 0x31b   :  { %v2406_v21 = vpack.c.bf16 %v1074_v18, %v1069_v20  ;;  %v2153_v22 = vpop.f32.mrb[30].mxu1  ;;  %v2426_v43 = vpack.c.bf16 %v1239_v40, %v1238_v39  ;;  %2487 = vmatprep.subr.bf16.mxu0 %v2486_v13  ;;  %v1218_v20 = vld [vmem:[#allocation16 + $0x10] sm:$0xff]  ;;  %v2498_v11 = vpack.c.bf16 %v1492_v10, %v1491_v8 }
 0x31c   :  { %v1084_v23 = vadd.f32 %v2153_v22, %v3211_v9  ;;  %v1078_v24 = vpop.f32.mrb[31].mxu1 }
 0x31d   :  { %v1079_v27 = vadd.f32 %v3211_v9, %v1078_v24  ;;  %2407 = vmatprep.subr.bf16.mxu1 %v2406_v21  ;;  %v2422_v9 = vpack.c.bf16 %v1237_v36, %v1236_v35  ;;  %v1219_v21 = vld [vmem:[#allocation16 + $0x18] sm:$0xff] }
 0x31e   :  { %2409 = vmatpush3.bf16.msra.mxu1 %v2408_v44  ;;  %v1240_v44 = vld [vmem:[#allocation17 + $0x40] sm:$0xff]  ;;  %2489 = vmatpush3.bf16.msra.mxu0 %v2486_v13  ;;  %v2450_v25 = vpack.c.bf16 %v1219_v21, %v1218_v20  ;;  %v1494_v13 = vld [vmem:[#allocation19 + $0x68] sm:$0xff] }
 0x31f   :  { %v2410_v28 = vpack.c.bf16 %v1084_v23, %v1079_v27  ;;  %v2430_v48 = vpack.c.bf16 %v1241_v45, %v1240_v44  ;;  %2491 = vmatprep.subr.bf16.mxu0 %v2490_v16  ;;  %v1221_v27 = vld [vmem:[#allocation16 + $0x28] sm:$0xff]  ;;  %v1227_v44 = vld [vmem:[#allocation16 + $0x58] sm:$0xff]  ;;  %v2502_v14 = vpack.c.bf16 %v1494_v13, %v1493_v12 }
 0x320   :  { %v2454_v30 = vpack.c.bf16 %v1221_v27, %v1220_v26 }
 0x321   :  { %2411 = vmatprep.subr.bf16.mxu1 %v2410_v28 }
 0x322   :  { %2413 = vmatpush3.bf16.msra.mxu1 %v2412_v49  ;;  %v1242_v49 = vld [vmem:[#allocation17 + $0x50] sm:$0xff]  ;;  %2493 = vmatpush3.bf16.msra.mxu0 %v2490_v16  ;;  %v1496_v16 = vld [vmem:[#allocation19 + $0x78] sm:$0xff] }
 0x323   :  { %2415 = vmatprep.subr.bf16.mxu1 %v2414_v29  ;;  %v2434_v53 = vpack.c.bf16 %v1243_v50, %v1242_v49  ;;  %v1228_v49 = vld [vmem:[#allocation16 + $0x60] sm:$0xff]  ;;  %v1229_v50 = vld [vmem:[#allocation16 + $0x68] sm:$0xff]  ;;  %2495 = vmatprep.subr.bf16.mxu0 %v2494_v7 }
 0x324   :  { %v2470_v54 = vpack.c.bf16 %v1229_v50, %v1228_v49 }
 0x325   :  { %1168 = vmatmul.mubr.f32.vlgmr.msra.gmra.mrb[32].mxu1 %v1087_v32  ;;  %v1222_v32 = vld [vmem:[#allocation16 + $0x30] sm:$0xff] }
 0x326   :  { %1172 = vmatprep.mubr.f32.mxu1 %v1090_v33  ;;  %2417 = vmatpush3.bf16.msra.mxu1 %v2414_v29  ;;  %v1223_v33 = vld [vmem:[#allocation16 + $0x38] sm:$0xff] }
 0x327   :  { %2419 = vmatprep.subr.bf16.mxu1 %v2418_v34  ;;  %v2458_v36 = vpack.c.bf16 %v1223_v33, %v1222_v32  ;;  %2497 = vmatpush3.bf16.msra.mxu0 %v2494_v7 }
 0x328   :  { %2499 = vmatprep.subr.bf16.mxu0 %v2498_v11 }
 0x329   :  { %1173 = vmatmul.mubr.f32.gmra.mrb[34].mxu1 %v1089_v37 }
 0x32a   :  { %1177 = vmatprep.mubr.f32.mxu1 %v1092_v38  ;;  %2421 = vmatpush3.bf16.msra.mxu1 %v2418_v34  ;;  %v1224_v38 = vld [vmem:[#allocation16 + $0x40] sm:$0xff] }
 0x32b   :  { %2423 = vmatprep.subr.bf16.mxu1 %v2422_v9  ;;  %2501 = vmatpush3.bf16.msra.mxu0 %v2498_v11 }
 0x32c   :  { %2503 = vmatprep.subr.bf16.mxu0 %v2502_v14 }
 0x32d   :  { %1178 = vmatmul.mubr.f32.gmra.mrb[36].mxu1 %v1091_v41 }
 0x32e   :  { %1182 = vmatprep.mubr.f32.mxu1 %v1094_v42  ;;  %2425 = vmatpush3.bf16.msra.mxu1 %v2422_v9  ;;  %v1225_v9 = vld [vmem:[#allocation16 + $0x48] sm:$0xff] }
 0x32f   :  { %2427 = vmatprep.subr.bf16.mxu1 %v2426_v43  ;;  %v2462_v41 = vpack.c.bf16 %v1225_v9, %v1224_v38  ;;  %2505 = vmatpush3.bf16.msra.mxu0 %v2502_v14 }
 0x331   :  { %1183 = vmatmul.mubr.f32.gmra.mrb[38].mxu1 %v1093_v46 }
 0x332   :  { %1187 = vmatprep.mubr.f32.mxu1 %v1096_v47  ;;  %2429 = vmatpush3.bf16.msra.mxu1 %v2426_v43  ;;  %v1226_v43 = vld [vmem:[#allocation16 + $0x50] sm:$0xff] }
 0x333   :  { %2431 = vmatprep.subr.bf16.mxu1 %v2430_v48  ;;  %v2466_v47 = vpack.c.bf16 %v1227_v44, %v1226_v43 }
 0x335   :  { %1188 = vmatmul.mubr.f32.gmra.mrb[40].mxu1 %v1095_v51 }
 0x336   :  { %1192 = vmatprep.mubr.f32.mxu1 %v1098_v52  ;;  %2433 = vmatpush3.bf16.msra.mxu1 %v2430_v48 }
 0x337   :  { %2435 = vmatprep.subr.bf16.mxu1 %v2434_v53 }
 0x339   :  { %1193 = vmatmul.mubr.f32.gmra.mrb[42].mxu1 %v1097_v56  ;;  %v1231_v56 = vld [vmem:[#allocation16 + $0x78] sm:$0xff] }
 0x33a   :  { %1197 = vmatprep.mubr.f32.mxu1 %v1100_v57  ;;  %2437 = vmatpush3.bf16.msra.mxu1 %v2434_v53 }
 0x33b   :  { %2439 = vmatprep.subr.bf16.mxu1 %v2438_v58 }
 0x33d   :  { %1198 = vmatmul.mubr.f32.gmra.mrb[44].mxu1 %v1099_v59 }
 0x33e   :  { %1202 = vmatprep.mubr.f32.mxu1 %v1102_v60  ;;  %2441 = vmatpush3.bf16.msra.mxu1 %v2438_v58  ;;  %v2474_v60 = vpack.c.bf16 %v1231_v56, %v1230_v55 }
 0x33f   :  { %2443 = vmatprep.subr.bf16.mxu1 %v2442_v0 }
 0x341   :  { %1203 = vmatmul.mubr.f32.gmra.mrb[46].mxu1 %v1101_v61  ;;  %v1208_v61 = vld [vmem:[#allocation2] sm:$0xff] }
 0x342   :  { %2445 = vmatpush3.bf16.msra.mxu1 %v2442_v0  ;;  %v1211_v0 = vld [vmem:[#allocation2 + $0x18] sm:$0xff] }
 0x343   :  { %2447 = vmatprep.subr.bf16.mxu1 %v2446_v3 }
 0x3f8   :  { %v1818_v17 = vpop.f32.mrb[32].mxu1 }
 0x3f9   :  { %v1819_v18 = vpop.f32.mrb[33].mxu1 }
 0x3fa   :  { %v1820_v19 = vadd.f32 %v1819_v18, %v1818_v17  ;;  %v2506_v17 = vpack.c.bf16 %v1496_v16, %v1495_v15  ;;  %v1640_v18 = vld [vmem:[%s3283_s11] ss:$0 sm:$0xff] }
 0x3fc   :  { %v1821_v22 = vpop.f32.mrb[34].mxu1  ;;  %2186 = vmatprep.mubr.f32.mxu1 %v1820_v19  ;;  %2507 = vmatprep.subr.bf16.mxu0 %v2506_v17 }
 0x3fd   :  { %v1822_v23 = vpop.f32.mrb[35].mxu1  ;;  %2509 = vmatpush3.bf16.msra.mxu0 %v2506_v17 }
 0x3fe   :  { %v1823_v24 = vadd.f32 %v1822_v23, %v1821_v22 }
 0x400   :  { %2187 = vmatmul.mubr.f32.vlgmr.msra.gmra.mrb[48].mxu1 %v1823_v24  ;;  %v1824_v28 = vpop.f32.mrb[36].mxu1 }
 0x401   :  { %2449 = vmatpush3.bf16.msra.mxu1 %v2446_v3  ;;  %v1825_v29 = vpop.f32.mrb[37].mxu1  ;;  %v1214_v3 = vld [vmem:[#allocation2 + $0x30] sm:$0xff] }
 0x402   :  { %2451 = vmatprep.subr.bf16.mxu1 %v2450_v25  ;;  %v1826_v31 = vadd.f32 %v1825_v29, %v1824_v28 }
 0x404   :  { %v1827_v34 = vpop.f32.mrb[38].mxu1  ;;  %2189 = vmatprep.mubr.f32.mxu1 %v1826_v31 }
 0x405   :  { %2453 = vmatpush3.bf16.msra.mxu1 %v2450_v25  ;;  %v1828_v35 = vpop.f32.mrb[39].mxu1 }
 0x406   :  { %2455 = vmatprep.subr.bf16.mxu1 %v2454_v30  ;;  %v1829_v37 = vadd.f32 %v1828_v35, %v1827_v34 }
 0x408   :  { %v1830_v39 = vpop.f32.mrb[40].mxu1  ;;  %2190 = vmatmul.mubr.f32.gmra.mrb[50].mxu1 %v1829_v37 }
 0x409   :  { %2457 = vmatpush3.bf16.msra.mxu1 %v2454_v30  ;;  %v1831_v40 = vpop.f32.mrb[41].mxu1 }
 0x40a   :  { %2459 = vmatprep.subr.bf16.mxu1 %v2458_v36  ;;  %v1832_v42 = vadd.f32 %v1831_v40, %v1830_v39 }
 0x40c   :  { %v1833_v45 = vpop.f32.mrb[42].mxu1  ;;  %2192 = vmatprep.mubr.f32.mxu1 %v1832_v42  ;;  %v1641_v42 = vld [vmem:[%s3285_s13] ss:$0 sm:$0xff]  ;;  %s2888_s13 = scalar_lea.vmem %s1623_s27, 1024 }
 0x40d   :  { %2461 = vmatpush3.bf16.msra.mxu1 %v2458_v36  ;;  %v1834_v46 = vpop.f32.mrb[43].mxu1  ;;  %p2889_p6 = scmp.ne.s32.totalorder %s1623_s27, %s2888_s13  ;;  %p2894_p8 = scmp.lt.s32.totalorder %s2888_s13, %s2888_s13 }
 0x40e   :  { %2463 = vmatprep.subr.bf16.mxu1 %v2462_v41  ;;  %v1835_v48 = vadd.f32 %v1834_v46, %v1833_v45 }
 0x40f   :  { %p2895_p9 = por %p2894_p8, %p2893_p7 }
 0x410   :  { %v1836_v51 = vpop.f32.mrb[44].mxu1  ;;  %2193 = vmatmul.mubr.f32.gmra.mrb[52].mxu1 %v1835_v48 }
 0x411   :  { %2465 = vmatpush3.bf16.msra.mxu1 %v2462_v41  ;;  %v1837_v52 = vpop.f32.mrb[45].mxu1  ;;  %p2896_p10 = pnand %p2895_p9, %p2889_p6 }
 0x412   :  { %2467 = vmatprep.subr.bf16.mxu1 %v2466_v47  ;;  %v1838_v53 = vadd.f32 %v1837_v52, %v1836_v51 }
 0x414   :  { %v1839_v57 = vpop.f32.mrb[46].mxu1  ;;  %2195 = vmatprep.mubr.f32.mxu1 %v1838_v53 }
 0x415   :  { %2469 = vmatpush3.bf16.msra.mxu1 %v2466_v47  ;;  %v1840_v58 = vpop.f32.mrb[47].mxu1 }
 0x416   :  { %2471 = vmatprep.subr.bf16.mxu1 %v2470_v54  ;;  %v1841_v59 = vadd.f32 %v1840_v58, %v1839_v57 }
 0x418   :  { %2196 = vmatmul.mubr.f32.gmra.mrb[54].mxu1 %v1841_v59 }
 0x419   :  { %2473 = vmatpush3.bf16.msra.mxu1 %v2470_v54  ;;  %2230 = vmatprep.mubr.f32.mxu1 %v1208_v61 }
 0x41a   :  { %2475 = vmatprep.subr.bf16.mxu1 %v2474_v60 }
 0x41d   :  { %2477 = vmatpush3.bf16.msra.mxu1 %v2474_v60 }
 0x420   :  { %2231 = vmatmul.mubr.f32.vlgmr.msra.gmra.mrb[48].mxu1 %v1209_v62 }
 0x421   :  { %2233 = vmatprep.mubr.f32.mxu1 %v1210_v63 }
 0x424   :  { %2234 = vmatmul.mubr.f32.gmra.mrb[50].mxu1 %v1211_v0 }
 0x425   :  { %2236 = vmatprep.mubr.f32.mxu1 %v1212_v1 }
 0x428   :  { %2237 = vmatmul.mubr.f32.gmra.mrb[52].mxu1 %v1213_v2 }
 0x429   :  { %2239 = vmatprep.mubr.f32.mxu1 %v1214_v3 }
 0x42c   :  { %2240 = vmatmul.mubr.f32.gmra.mrb[54].mxu1 %v1215_v4 }
 0x4f3   :  { %v2232_v19 = vpop.f32.mrb[48].mxu1 }
 0x4f4   :  { %v1466_v20 = vadd.f32 %v2232_v19, %v1640_v18  ;;  %v1419_v21 = vpop.f32.mrb[49].mxu1 }
 0x4f5   :  { %v1465_v22 = vadd.f32 %v1640_v18, %v1419_v21 }
 0x4f7   :  { %2630 = vtanh.f32 %v1465_v22  ;;  %v2235_v23 = vpop.f32.mrb[50].mxu1 }
 0x4f8   :  { %2632 = vtanh.f32 %v1466_v20  ;;  %v1468_v24 = vadd.f32 %v2235_v23, %v1640_v18  ;;  %v1429_v25 = vpop.f32.mrb[51].mxu1 }
 0x4f9   :  { %v1467_v26 = vadd.f32 %v1640_v18, %v1429_v25 }
 0x4fb   :  { %2634 = vtanh.f32 %v1467_v26  ;;  %v2238_v27 = vpop.f32.mrb[52].mxu1 }
 0x4fc   :  { %2636 = vtanh.f32 %v1468_v24  ;;  %v1470_v28 = vadd.f32 %v2238_v27, %v1640_v18  ;;  %v1439_v29 = vpop.f32.mrb[53].mxu1 }
 0x4fd   :  { %v1469_v30 = vadd.f32 %v1640_v18, %v1439_v29 }
 0x4ff   :  { %2638 = vtanh.f32 %v1469_v30  ;;  %v2241_v31 = vpop.f32.mrb[54].mxu1 }
 0x500   :  { %2640 = vtanh.f32 %v1470_v28  ;;  %v1472_v32 = vadd.f32 %v2241_v31, %v1640_v18  ;;  %v1449_v33 = vpop.f32.mrb[55].mxu1 }
 0x501   :  { %v2631_v34 = vpop.eup %2630  ;;  %v1471_v35 = vadd.f32 %v1640_v18, %v1449_v33 }
 0x502   :  { %v2633_v36 = vpop.eup %2632  ;;  %2274 = vmatprep.mubr.f32.mxu0 %v2631_v34 }
 0x503   :  { %2275 = vmatmul.mubr.f32.vlgmr.msra.gmra.mrb[32].mxu0 %v2633_v36  ;;  %2642 = vtanh.f32 %v1471_v35 }
 0x504   :  { %2644 = vtanh.f32 %v1472_v32 }
 0x505   :  { %v2635_v37 = vpop.eup %2634 }
 0x506   :  { %v2637_v38 = vpop.eup %2636  ;;  %2277 = vmatprep.mubr.f32.mxu0 %v2635_v37 }
 0x507   :  { %2278 = vmatmul.mubr.f32.gmra.mrb[34].mxu0 %v2637_v38 }
 0x509   :  { %v2639_v9 = vpop.eup %2638 }
 0x50a   :  { %v2641_v39 = vpop.eup %2640  ;;  %2280 = vmatprep.mubr.f32.mxu0 %v2639_v9 }
 0x50b   :  { %2281 = vmatmul.mubr.f32.gmra.mrb[36].mxu0 %v2641_v39 }
 0x50d   :  { %v2643_v40 = vpop.eup %2642 }
 0x50e   :  { %v2645_v41 = vpop.eup %2644  ;;  %2283 = vmatprep.mubr.f32.mxu0 %v2643_v40 }
 0x50f   :  { %2284 = vmatmul.mubr.f32.gmra.mrb[38].mxu0 %v2645_v41 }
 0x5d6   :  { %v2276_v43 = vpop.f32.mrb[32].mxu0 }
 0x5d7   :  { %v1576_v44 = vadd.f32 %v2276_v43, %v1641_v42  ;;  %v1570_v45 = vpop.f32.mrb[33].mxu0 }
 0x5d8   :  { %v1571_v46 = vadd.f32 %v1641_v42, %v1570_v45 }
 0x5d9   :  { %1610 = vst [vmem:[#allocation20 + $0x8] sm:$0xff] %v1576_v44 }
 0x5da   :  { %1609 = vst [vmem:[#allocation20] sm:$0xff] %v1571_v46  ;;  %v2279_v47 = vpop.f32.mrb[34].mxu0 }
 0x5db   :  { %v1586_v48 = vadd.f32 %v2279_v47, %v1641_v42  ;;  %v1580_v49 = vpop.f32.mrb[35].mxu0 }
 0x5dc   :  { %v1581_v50 = vadd.f32 %v1641_v42, %v1580_v49 }
 0x5dd   :  { %1612 = vst [vmem:[#allocation20 + $0x18] sm:$0xff] %v1586_v48 }
 0x5de   :  { %1611 = vst [vmem:[#allocation20 + $0x10] sm:$0xff] %v1581_v50  ;;  %v2282_v51 = vpop.f32.mrb[36].mxu0 }
 0x5df   :  { %v1596_v52 = vadd.f32 %v2282_v51, %v1641_v42  ;;  %v1590_v53 = vpop.f32.mrb[37].mxu0 }
 0x5e0   :  { %v1591_v54 = vadd.f32 %v1641_v42, %v1590_v53 }
 0x5e1   :  { %1614 = vst [vmem:[#allocation20 + $0x28] sm:$0xff] %v1596_v52 }
 0x5e2   :  { %1613 = vst [vmem:[#allocation20 + $0x20] sm:$0xff] %v1591_v54  ;;  %v2285_v55 = vpop.f32.mrb[38].mxu0 }
 0x5e3   :  { %v1606_v56 = vadd.f32 %v2285_v55, %v1641_v42  ;;  %v1600_v57 = vpop.f32.mrb[39].mxu0 }
 0x5e4   :  { %v1601_v58 = vadd.f32 %v1641_v42, %v1600_v57 }
 0x5e5   :  { %1616 = vst [vmem:[#allocation20 + $0x38] sm:$0xff] %v1606_v56 }
 0x5e6   :  { %1615 = vst [vmem:[#allocation20 + $0x30] sm:$0xff] %v1601_v58 }
 0x5e7   :  { %2899 = shalt.err (!%p2896_p10)
}
 0x5e8   :  { %s2900_s29 = scalar_lea.hbm %s3286_s14, 1024 }
 0x5e9   :  { %p2901_p11 = scmp.ne.s32.totalorder %s3286_s14, %s2900_s29  ;;  %p2904_p12 = scmp.lt.u32.totalorder %s2900_s29, %s3286_s14 }
 0x5eb   :  { %p2906_p13 = pnand %p2904_p12, %p2901_p11 }
 0x5ed   :  { %2909 = shalt.err (!%p2906_p13)
}
 0x5ee   :  { %1628 = dma.vmem_to_hbm [thread:$0]  %s1623_s27, 1024, %s3286_s14, [#allocation4], %s2926_s25, %s2926_s25, %s2927_s26  }
 0x5ef   :  { %2922 = dma.done.wait [#allocation4], 1024  }
 0x5f0   :  { %2923 = vsyncadd [#allocation4], 4294966272 }
 0x5f1   :  { %1632 = vsyncpa [#allocation3], 1 }
 0x5f2   :  { %1633 = vsyncpa [#allocation6], 1 }
 0x5f3   :  { %1634 = vsyncpa [#allocation9], 1 }
 0x5f4   :  { %1635 = vsyncpa [#allocation12], 1 }
 0x5f5   :  { %1636 = vsyncpa [#allocation15], 1 }
 0x5f6   :  { %1637 = vsyncpa [#allocation18], 1 }
 0x5f7   :  { %1638 = vsyncpa [#allocation4], 1 }

</bundles_post_ra>
